<compile_context>
chip_gen: v5e
topology: v5e:2x2
jax: 0.10.0
libtpu: 0.0.40
codegen_flags: <defaults>
</compile_context>

<pallas_src>
import functools

import jax
import jax.numpy as jnp
from jax import lax
from jax.experimental import pallas as pl
from jax.experimental.pallas import tpu as pltpu


def _round_up(n, m):
    return ((n + m - 1) // m) * m


# ---------------------------------------------------------------------------
# Kernel: whole adapter (both decoders, all layers, all timesteps).
# ---------------------------------------------------------------------------
def _fused_dual_lstm_kernel(num_layers, hidden_size, batch_pad, seq_len, *refs):
    """Refs (all fully resident in VMEM):

      xs_ref    : (L*Bp, 2D) bf16  combined inputs, row = t*Bp + b, feature
                                   layout [x_recon | x_pred]
      wih0_ref  : (2D, 8H)   bf16  layer-0 input weights (block-diag, gate-interleaved)
      whh0_ref  : (2H, 8H)   bf16  layer-0 recurrent weights (block-diag)
      b0_ref    : (1, 8H)    f32
      per layer l >= 1:
        wih_ref : (2H, 8H) bf16, whh_ref : (2H, 8H) bf16, b_ref : (1, 8H) f32
      out_ref   : (L*Bp, 2H) f32   last layer hidden sequence [h_recon | h_pred]
      gates_ref : (L*Bp, 8H) f32   scratch: gate pre-activations of current layer

    Gate column layout (H wide each): [i_r i_p | f_r f_p | g_r g_p | o_r o_p].
    """
    H = hidden_size
    Bp = batch_pad
    L = seq_len
    H2 = 2 * H

    xs_ref, wih0_ref, whh0_ref, b0_ref = refs[:4]
    rest = refs[4:-2]
    out_ref = refs[-2]
    gates_ref = refs[-1]

    unroll = min(max(L, 1), 8)
    zeros = jnp.zeros((Bp, H2), jnp.float32)

    def cell(g, c_prev):
        # One full-width sigmoid pass covers the i/f/o gates of BOTH decoders;
        # the g-gate lanes of `s` are discarded (cheap EUP filler).
        s = jax.nn.sigmoid(g)
        i_g = s[:, 0 * H2:1 * H2]
        f_g = s[:, 1 * H2:2 * H2]
        o_g = s[:, 3 * H2:4 * H2]
        g_g = jnp.tanh(g[:, 2 * H2:3 * H2])
        c_new = f_g * c_prev + i_g * g_g
        h_new = o_g * jnp.tanh(c_new)
        return h_new, c_new

    def recurrence(whh):
        # Only h_prev @ W_hh sits on the serialized critical path: the input
        # projection for this layer was bulk-precomputed into gates_ref.
        # TODO(synk): pltpu.matmul_push_rhs could keep `whh` resident in the
        # MXU across the loop; left as jnp.dot for portability/robustness.
        def step(t, carry):
            h_prev, c_prev = carry
            r0 = pl.multiple_of(t * Bp, 8)
            g = gates_ref[pl.ds(r0, Bp), :] + jnp.dot(
                h_prev.astype(whh.dtype), whh,
                preferred_element_type=jnp.float32)
            h_new, c_new = cell(g, c_prev)
            out_ref[pl.ds(r0, Bp), :] = h_new
            return h_new, c_new

        lax.fori_loop(0, L, step, (zeros, zeros), unroll=unroll)

    # ---- Layer 0: one MXU-efficient full-sequence input projection
    # (M = L*Bp, K = 2D, N = 8H), then the latency-bound recurrence.
    gates_ref[...] = jnp.dot(xs_ref[...], wih0_ref[...],
                             preferred_element_type=jnp.float32) + b0_ref[...]
    recurrence(whh0_ref[...])

    # ---- Layers >= 1: the previous layer's hidden sequence is staged in
    # out_ref (never leaves VMEM).  Bulk-project the whole sequence, then run
    # this layer's recurrence, overwriting out_ref in place.
    for l in range(1, num_layers):
        wih_ref, whh_ref, b_ref = rest[3 * (l - 1):3 * l]
        gates_ref[...] = jnp.dot(out_ref[...].astype(wih_ref.dtype),
                                 wih_ref[...],
                                 preferred_element_type=jnp.float32) + b_ref[...]
        recurrence(whh_ref[...])


def _run_fused_kernel(xs_flat, wih0, whh0, b0, layer_ws, L, Bp, H, num_layers):
    args = [xs_flat, wih0, whh0, b0]
    for (wih, whh, b) in layer_ws:
        args += [wih, whh, b]

    vmem = pltpu.MemorySpace.VMEM
    return pl.pallas_call(
        functools.partial(_fused_dual_lstm_kernel, num_layers, H, Bp, L),
        out_shape=jax.ShapeDtypeStruct((L * Bp, 2 * H), jnp.float32),
        in_specs=[pl.BlockSpec(memory_space=vmem)] * len(args),
        out_specs=pl.BlockSpec(memory_space=vmem),
        scratch_shapes=[pltpu.VMEM((L * Bp, 8 * H), jnp.float32)],
    )(*args)


# ---------------------------------------------------------------------------
# Adapter wrapper (matches DualLSTMDecoderAdapter.forward, hidden_and_cell=None)
# ---------------------------------------------------------------------------
def dual_lstm_decoder_adapter(x, recon_params, pred_params):
    # TODO(synk): hidden_and_cell is fixed to None (zero initial state).
    B, T, D = x.shape
    num_layers = len(recon_params)
    H = recon_params[0]["w_hh"].shape[1]

    last_output = x[:, 0:1, :]
    length = T // 2
    Lmax = T - length
    recon_part = x[:, :length, :]
    future_part = jnp.concatenate([last_output, x[:, length:T - 1, :]], axis=1)
    if length < Lmax:  # odd T: zero-pad the recon segment (causal -> harmless)
        pad = jnp.zeros((B, Lmax - length, D), x.dtype)
        recon_part = jnp.concatenate([recon_part, pad], axis=1)

    # Fuse both decoders along the feature axis: x_comb = [x_recon | x_pred].
    xs = jnp.concatenate([recon_part, future_part], axis=-1)     # (B, Lmax, 2D)
    xs = jnp.transpose(xs, (1, 0, 2))                            # (Lmax, B, 2D)
    Bp = _round_up(B, 8)   # pad batch so each timestep is a full sublane group
    if Bp > B:
        xs = jnp.concatenate(
            [xs, jnp.zeros((Lmax, Bp - B, 2 * D), xs.dtype)], axis=1)
    xs_flat = xs.reshape(Lmax * Bp, 2 * D).astype(jnp.bfloat16)

    def combine_w(w_r, w_p):
        # w_*: torch layout (4H, K), gate order i,f,g,o.  Build the combined
        # transposed weight (Kr+Kp, 8H): block-diagonal over decoders, gate
        # columns interleaved [i_r i_p | f_r f_p | g_r g_p | o_r o_p].
        wrT, wpT = w_r.T, w_p.T
        Kr, Kp = wrT.shape[0], wpT.shape[0]
        zr = jnp.zeros((Kr, H), w_r.dtype)
        zp = jnp.zeros((Kp, H), w_p.dtype)
        cols = []
        for gi in range(4):
            cols.append(jnp.concatenate([wrT[:, gi * H:(gi + 1) * H], zp], axis=0))
            cols.append(jnp.concatenate([zr, wpT[:, gi * H:(gi + 1) * H]], axis=0))
        return jnp.concatenate(cols, axis=1).astype(jnp.bfloat16)

    def combine_b(b_r, b_p):
        parts = []
        for gi in range(4):
            parts.append(b_r[gi * H:(gi + 1) * H])
            parts.append(b_p[gi * H:(gi + 1) * H])
        return jnp.concatenate(parts).reshape(1, 8 * H).astype(jnp.float32)

    wih0 = combine_w(recon_params[0]["w_ih"], pred_params[0]["w_ih"])   # (2D, 8H)
    whh0 = combine_w(recon_params[0]["w_hh"], pred_params[0]["w_hh"])   # (2H, 8H)
    b0 = combine_b(recon_params[0]["b"], pred_params[0]["b"])

    layer_ws = []
    for l in range(1, num_layers):
        layer_ws.append((
            combine_w(recon_params[l]["w_ih"], pred_params[l]["w_ih"]),
            combine_w(recon_params[l]["w_hh"], pred_params[l]["w_hh"]),
            combine_b(recon_params[l]["b"], pred_params[l]["b"]),
        ))

    out = _run_fused_kernel(xs_flat, wih0, whh0, b0, layer_ws,
                            Lmax, Bp, H, num_layers)             # (Lmax*Bp, 2H)

    out = out.reshape(Lmax, Bp, 2 * H)[:, :B, :]                 # (Lmax, B, 2H)
    recon = jnp.transpose(out[:length, :, :H], (1, 0, 2))[:, ::-1, :]  # (B, length, H)
    pred = jnp.transpose(out[:, :, H:], (1, 0, 2))               # (B, Lmax, H)
    output = jnp.concatenate([recon, pred], axis=1)              # (B, T, H)
    return output, None


# ---------------------------------------------------------------------------
# Parameter init (nn.LSTM-style) and a pure-JAX reference for validation.
# ---------------------------------------------------------------------------
def _init_lstm_params(key, input_size, hidden_size, num_layers):
    params = []
    k = 1.0 / jnp.sqrt(jnp.float32(hidden_size))
    for layer in range(num_layers):
        d_in = input_size if layer == 0 else hidden_size
        key, k1, k2, k3, k4 = jax.random.split(key, 5)
        w_ih = jax.random.uniform(k1, (4 * hidden_size, d_in), jnp.float32, -k, k)
        w_hh = jax.random.uniform(k2, (4 * hidden_size, hidden_size), jnp.float32, -k, k)
        b_ih = jax.random.uniform(k3, (4 * hidden_size,), jnp.float32, -k, k)
        b_hh = jax.random.uniform(k4, (4 * hidden_size,), jnp.float32, -k, k)
        params.append({"w_ih": w_ih, "w_hh": w_hh, "b": b_ih + b_hh})
    return params, key


def _ref_lstm(x_btd, params):
    B = x_btd.shape[0]
    h_seq = x_btd.astype(jnp.float32)
    for layer in params:
        H = layer["w_hh"].shape[1]
        wihT = layer["w_ih"].T.astype(jnp.bfloat16)
        whhT = layer["w_hh"].T.astype(jnp.bfloat16)
        b = layer["b"].astype(jnp.float32)
        h = jnp.zeros((B, H), jnp.float32)
        c = jnp.zeros((B, H), jnp.float32)
        outs = []
        for t in range(h_seq.shape[1]):
            x_t = h_seq[:, t, :].astype(jnp.bfloat16)
            g = (jnp.dot(x_t, wihT, preferred_element_type=jnp.float32)
                 + jnp.dot(h.astype(jnp.bfloat16), whhT,
                           preferred_element_type=jnp.float32) + b)
            i_g = jax.nn.sigmoid(g[:, :H])
            f_g = jax.nn.sigmoid(g[:, H:2 * H])
            g_g = jnp.tanh(g[:, 2 * H:3 * H])
            o_g = jax.nn.sigmoid(g[:, 3 * H:])
            c = f_g * c + i_g * g_g
            h = o_g * jnp.tanh(c)
            outs.append(h)
        h_seq = jnp.stack(outs, axis=1)
    return h_seq


def _ref_adapter(x, recon_params, pred_params):
    last = x[:, 0:1, :]
    length = x.shape[1] // 2
    rec = _ref_lstm(x[:, :length, :], recon_params)
    fut = _ref_lstm(jnp.concatenate([last, x[:, length:-1, :]], axis=1), pred_params)
    return jnp.concatenate([rec[:, ::-1, :], fut], axis=1)


if __name__ == "__main__":
    B, T = 2, 8
    INPUT_SIZE, HIDDEN_SIZE, NUM_LAYERS = 32, 32, 2

    key = jax.random.PRNGKey(0)
    key, xk = jax.random.split(key)
    x = jax.random.normal(xk, (B, T, INPUT_SIZE), jnp.float32)

    recon_params, key = _init_lstm_params(key, INPUT_SIZE, HIDDEN_SIZE, NUM_LAYERS)
    pred_params, key = _init_lstm_params(key, INPUT_SIZE, HIDDEN_SIZE, NUM_LAYERS)

    run = jax.jit(functools.partial(dual_lstm_decoder_adapter,
                                    recon_params=recon_params,
                                    pred_params=pred_params))
    output, _ = run(x)
    jax.block_until_ready(output)

    assert output.shape == (B, T, HIDDEN_SIZE), output.shape

    ref = _ref_adapter(x, recon_params, pred_params)
    err = float(jnp.max(jnp.abs(output - ref)))
    assert err < 1e-3, f"max abs error vs reference: {err}"

    print("KERNEL_OK")
</pallas_src>

<mosaic_0001>
module attributes {stable_mosaic.version = 11 : i64} {
  func.func @_fused_dual_lstm_kernel(%arg0: memref<32x64xbf16, #tpu.memory_space<vmem>>, %arg1: memref<64x256xbf16, #tpu.memory_space<vmem>>, %arg2: memref<64x256xbf16, #tpu.memory_space<vmem>>, %arg3: memref<1x256xf32, #tpu.memory_space<vmem>>, %arg4: memref<64x256xbf16, #tpu.memory_space<vmem>>, %arg5: memref<64x256xbf16, #tpu.memory_space<vmem>>, %arg6: memref<1x256xf32, #tpu.memory_space<vmem>>, %arg7: memref<32x64xf32, #tpu.memory_space<vmem>>, %arg8: memref<32x256xf32, #tpu.memory_space<vmem>>) attributes {dimension_semantics = [], scalar_prefetch = 0 : i64, scratch_operands = 1 : i64, tpu.core_type = #tpu.core_type<tc>} {
    %cst = arith.constant 0.000000e+00 : f32
    %0 = vector.broadcast %cst : f32 to vector<8x64xf32>
    %c0 = arith.constant 0 : index
    %c0_0 = arith.constant 0 : index
    %1 = vector.load %arg0[%c0, %c0_0] : memref<32x64xbf16, #tpu.memory_space<vmem>>, vector<32x64xbf16>
    %c0_1 = arith.constant 0 : index
    %c0_2 = arith.constant 0 : index
    %2 = vector.load %arg1[%c0_1, %c0_2] : memref<64x256xbf16, #tpu.memory_space<vmem>>, vector<64x256xbf16>
    %cst_3 = arith.constant dense<0.000000e+00> : vector<32x256xf32>
    %3 = tpu.matmul %1, %2, %cst_3 {dimension_numbers = #tpu.dot_dimension_numbers<[1], [0], [0], [1], [0, 0, 1, 1], [], []>} : vector<32x64xbf16>, vector<64x256xbf16>, vector<32x256xf32> -> vector<32x256xf32>
    %c0_4 = arith.constant 0 : index
    %c0_5 = arith.constant 0 : index
    %4 = vector.load %arg3[%c0_4, %c0_5] : memref<1x256xf32, #tpu.memory_space<vmem>>, vector<1x256xf32>
    %5 = vector.broadcast %4 : vector<1x256xf32> to vector<32x256xf32>
    %6 = arith.addf %3, %5 : vector<32x256xf32>
    %c0_6 = arith.constant 0 : index
    %c0_7 = arith.constant 0 : index
    %7 = vector.load %arg8[%c0_6, %c0_7] : memref<32x256xf32, #tpu.memory_space<vmem>>, vector<32x256xf32>
    tpu.vector_store %arg8[%c0_6, %c0_7], %6 {strides = array<i32>} : memref<32x256xf32, #tpu.memory_space<vmem>>, vector<32x256xf32>,
    %c0_8 = arith.constant 0 : index
    %c0_9 = arith.constant 0 : index
    %8 = vector.load %arg2[%c0_8, %c0_9] : memref<64x256xbf16, #tpu.memory_space<vmem>>, vector<64x256xbf16>
    %c0_i32 = arith.constant 0 : i32
    %c8_i32 = arith.constant 8 : i32
    %9 = arith.muli %c0_i32, %c8_i32 : i32
    %10 = tpu.assume_multiple %9, 8 : i32
    %11 = arith.index_cast %10 : i32 to index
    %c0_10 = arith.constant 0 : index
    %12 = vector.load %arg8[%11, %c0_10] : memref<32x256xf32, #tpu.memory_space<vmem>>, vector<8x256xf32>
    %13 = arith.truncf %0 : vector<8x64xf32> to vector<8x64xbf16>
    %cst_11 = arith.constant dense<0.000000e+00> : vector<8x256xf32>
    %14 = tpu.matmul %13, %8, %cst_11 {dimension_numbers = #tpu.dot_dimension_numbers<[1], [0], [0], [1], [0, 0, 1, 1], [], []>} : vector<8x64xbf16>, vector<64x256xbf16>, vector<8x256xf32> -> vector<8x256xf32>
    %15 = arith.addf %12, %14 : vector<8x256xf32>
    %16 = arith.negf %15 : vector<8x256xf32>
    %17 = math.exp %16 : vector<8x256xf32>
    %cst_12 = arith.constant 1.000000e+00 : f32
    %18 = vector.broadcast %cst_12 : f32 to vector<8x256xf32>
    %19 = arith.addf %18, %17 : vector<8x256xf32>
    %20 = arith.divf %18, %19 : vector<8x256xf32>
    %21 = vector.extract_strided_slice %20 {offsets = [0, 0], sizes = [8, 64], strides = [1, 1]} : vector<8x256xf32> to vector<8x64xf32>
    %22 = vector.extract_strided_slice %20 {offsets = [0, 64], sizes = [8, 64], strides = [1, 1]} : vector<8x256xf32> to vector<8x64xf32>
    %23 = vector.extract_strided_slice %20 {offsets = [0, 192], sizes = [8, 64], strides = [1, 1]} : vector<8x256xf32> to vector<8x64xf32>
    %24 = vector.extract_strided_slice %15 {offsets = [0, 128], sizes = [8, 64], strides = [1, 1]} : vector<8x256xf32> to vector<8x64xf32>
    %25 = math.tanh %24 : vector<8x64xf32>
    %26 = arith.mulf %22, %0 : vector<8x64xf32>
    %27 = arith.mulf %21, %25 : vector<8x64xf32>
    %28 = arith.addf %26, %27 : vector<8x64xf32>
    %29 = math.tanh %28 : vector<8x64xf32>
    %30 = arith.mulf %23, %29 : vector<8x64xf32>
    %31 = arith.index_cast %10 : i32 to index
    %c0_13 = arith.constant 0 : index
    %32 = vector.load %arg7[%31, %c0_13] : memref<32x64xf32, #tpu.memory_space<vmem>>, vector<8x64xf32>
    tpu.vector_store %arg7[%31, %c0_13], %30 {strides = array<i32>} : memref<32x64xf32, #tpu.memory_space<vmem>>, vector<8x64xf32>,
    %c1_i32 = arith.constant 1 : i32
    %c8_i32_14 = arith.constant 8 : i32
    %33 = arith.muli %c1_i32, %c8_i32_14 : i32
    %34 = tpu.assume_multiple %33, 8 : i32
    %35 = arith.index_cast %34 : i32 to index
    %c0_15 = arith.constant 0 : index
    %36 = vector.load %arg8[%35, %c0_15] : memref<32x256xf32, #tpu.memory_space<vmem>>, vector<8x256xf32>
    %37 = arith.truncf %30 : vector<8x64xf32> to vector<8x64xbf16>
    %cst_16 = arith.constant dense<0.000000e+00> : vector<8x256xf32>
    %38 = tpu.matmul %37, %8, %cst_16 {dimension_numbers = #tpu.dot_dimension_numbers<[1], [0], [0], [1], [0, 0, 1, 1], [], []>} : vector<8x64xbf16>, vector<64x256xbf16>, vector<8x256xf32> -> vector<8x256xf32>
    %39 = arith.addf %36, %38 : vector<8x256xf32>
    %40 = arith.negf %39 : vector<8x256xf32>
    %41 = math.exp %40 : vector<8x256xf32>
    %cst_17 = arith.constant 1.000000e+00 : f32
    %42 = vector.broadcast %cst_17 : f32 to vector<8x256xf32>
    %43 = arith.addf %42, %41 : vector<8x256xf32>
    %44 = arith.divf %42, %43 : vector<8x256xf32>
    %45 = vector.extract_strided_slice %44 {offsets = [0, 0], sizes = [8, 64], strides = [1, 1]} : vector<8x256xf32> to vector<8x64xf32>
    %46 = vector.extract_strided_slice %44 {offsets = [0, 64], sizes = [8, 64], strides = [1, 1]} : vector<8x256xf32> to vector<8x64xf32>
    %47 = vector.extract_strided_slice %44 {offsets = [0, 192], sizes = [8, 64], strides = [1, 1]} : vector<8x256xf32> to vector<8x64xf32>
    %48 = vector.extract_strided_slice %39 {offsets = [0, 128], sizes = [8, 64], strides = [1, 1]} : vector<8x256xf32> to vector<8x64xf32>
    %49 = math.tanh %48 : vector<8x64xf32>
    %50 = arith.mulf %46, %28 : vector<8x64xf32>
    %51 = arith.mulf %45, %49 : vector<8x64xf32>
    %52 = arith.addf %50, %51 : vector<8x64xf32>
    %53 = math.tanh %52 : vector<8x64xf32>
    %54 = arith.mulf %47, %53 : vector<8x64xf32>
    %55 = arith.index_cast %34 : i32 to index
    %c0_18 = arith.constant 0 : index
    %56 = vector.load %arg7[%55, %c0_18] : memref<32x64xf32, #tpu.memory_space<vmem>>, vector<8x64xf32>
    tpu.vector_store %arg7[%55, %c0_18], %54 {strides = array<i32>} : memref<32x64xf32, #tpu.memory_space<vmem>>, vector<8x64xf32>,
    %c2_i32 = arith.constant 2 : i32
    %c8_i32_19 = arith.constant 8 : i32
    %57 = arith.muli %c2_i32, %c8_i32_19 : i32
    %58 = tpu.assume_multiple %57, 8 : i32
    %59 = arith.index_cast %58 : i32 to index
    %c0_20 = arith.constant 0 : index
    %60 = vector.load %arg8[%59, %c0_20] : memref<32x256xf32, #tpu.memory_space<vmem>>, vector<8x256xf32>
    %61 = arith.truncf %54 : vector<8x64xf32> to vector<8x64xbf16>
    %cst_21 = arith.constant dense<0.000000e+00> : vector<8x256xf32>
    %62 = tpu.matmul %61, %8, %cst_21 {dimension_numbers = #tpu.dot_dimension_numbers<[1], [0], [0], [1], [0, 0, 1, 1], [], []>} : vector<8x64xbf16>, vector<64x256xbf16>, vector<8x256xf32> -> vector<8x256xf32>
    %63 = arith.addf %60, %62 : vector<8x256xf32>
    %64 = arith.negf %63 : vector<8x256xf32>
    %65 = math.exp %64 : vector<8x256xf32>
    %cst_22 = arith.constant 1.000000e+00 : f32
    %66 = vector.broadcast %cst_22 : f32 to vector<8x256xf32>
    %67 = arith.addf %66, %65 : vector<8x256xf32>
    %68 = arith.divf %66, %67 : vector<8x256xf32>
    %69 = vector.extract_strided_slice %68 {offsets = [0, 0], sizes = [8, 64], strides = [1, 1]} : vector<8x256xf32> to vector<8x64xf32>
    %70 = vector.extract_strided_slice %68 {offsets = [0, 64], sizes = [8, 64], strides = [1, 1]} : vector<8x256xf32> to vector<8x64xf32>
    %71 = vector.extract_strided_slice %68 {offsets = [0, 192], sizes = [8, 64], strides = [1, 1]} : vector<8x256xf32> to vector<8x64xf32>
    %72 = vector.extract_strided_slice %63 {offsets = [0, 128], sizes = [8, 64], strides = [1, 1]} : vector<8x256xf32> to vector<8x64xf32>
    %73 = math.tanh %72 : vector<8x64xf32>
    %74 = arith.mulf %70, %52 : vector<8x64xf32>
    %75 = arith.mulf %69, %73 : vector<8x64xf32>
    %76 = arith.addf %74, %75 : vector<8x64xf32>
    %77 = math.tanh %76 : vector<8x64xf32>
    %78 = arith.mulf %71, %77 : vector<8x64xf32>
    %79 = arith.index_cast %58 : i32 to index
    %c0_23 = arith.constant 0 : index
    %80 = vector.load %arg7[%79, %c0_23] : memref<32x64xf32, #tpu.memory_space<vmem>>, vector<8x64xf32>
    tpu.vector_store %arg7[%79, %c0_23], %78 {strides = array<i32>} : memref<32x64xf32, #tpu.memory_space<vmem>>, vector<8x64xf32>,
    %c3_i32 = arith.constant 3 : i32
    %c8_i32_24 = arith.constant 8 : i32
    %81 = arith.muli %c3_i32, %c8_i32_24 : i32
    %82 = tpu.assume_multiple %81, 8 : i32
    %83 = arith.index_cast %82 : i32 to index
    %c0_25 = arith.constant 0 : index
    %84 = vector.load %arg8[%83, %c0_25] : memref<32x256xf32, #tpu.memory_space<vmem>>, vector<8x256xf32>
    %85 = arith.truncf %78 : vector<8x64xf32> to vector<8x64xbf16>
    %cst_26 = arith.constant dense<0.000000e+00> : vector<8x256xf32>
    %86 = tpu.matmul %85, %8, %cst_26 {dimension_numbers = #tpu.dot_dimension_numbers<[1], [0], [0], [1], [0, 0, 1, 1], [], []>} : vector<8x64xbf16>, vector<64x256xbf16>, vector<8x256xf32> -> vector<8x256xf32>
    %87 = arith.addf %84, %86 : vector<8x256xf32>
    %88 = arith.negf %87 : vector<8x256xf32>
    %89 = math.exp %88 : vector<8x256xf32>
    %cst_27 = arith.constant 1.000000e+00 : f32
    %90 = vector.broadcast %cst_27 : f32 to vector<8x256xf32>
    %91 = arith.addf %90, %89 : vector<8x256xf32>
    %92 = arith.divf %90, %91 : vector<8x256xf32>
    %93 = vector.extract_strided_slice %92 {offsets = [0, 0], sizes = [8, 64], strides = [1, 1]} : vector<8x256xf32> to vector<8x64xf32>
    %94 = vector.extract_strided_slice %92 {offsets = [0, 64], sizes = [8, 64], strides = [1, 1]} : vector<8x256xf32> to vector<8x64xf32>
    %95 = vector.extract_strided_slice %92 {offsets = [0, 192], sizes = [8, 64], strides = [1, 1]} : vector<8x256xf32> to vector<8x64xf32>
    %96 = vector.extract_strided_slice %87 {offsets = [0, 128], sizes = [8, 64], strides = [1, 1]} : vector<8x256xf32> to vector<8x64xf32>
    %97 = math.tanh %96 : vector<8x64xf32>
    %98 = arith.mulf %94, %76 : vector<8x64xf32>
    %99 = arith.mulf %93, %97 : vector<8x64xf32>
    %100 = arith.addf %98, %99 : vector<8x64xf32>
    %101 = math.tanh %100 : vector<8x64xf32>
    %102 = arith.mulf %95, %101 : vector<8x64xf32>
    %103 = arith.index_cast %82 : i32 to index
    %c0_28 = arith.constant 0 : index
    %104 = vector.load %arg7[%103, %c0_28] : memref<32x64xf32, #tpu.memory_space<vmem>>, vector<8x64xf32>
    tpu.vector_store %arg7[%103, %c0_28], %102 {strides = array<i32>} : memref<32x64xf32, #tpu.memory_space<vmem>>, vector<8x64xf32>,
    %c4_i32 = arith.constant 4 : i32
    %c0_29 = arith.constant 0 : index
    %c0_30 = arith.constant 0 : index
    %105 = vector.load %arg7[%c0_29, %c0_30] : memref<32x64xf32, #tpu.memory_space<vmem>>, vector<32x64xf32>
    %106 = arith.truncf %105 : vector<32x64xf32> to vector<32x64xbf16>
    %c0_31 = arith.constant 0 : index
    %c0_32 = arith.constant 0 : index
    %107 = vector.load %arg4[%c0_31, %c0_32] : memref<64x256xbf16, #tpu.memory_space<vmem>>, vector<64x256xbf16>
    %cst_33 = arith.constant dense<0.000000e+00> : vector<32x256xf32>
    %108 = tpu.matmul %106, %107, %cst_33 {dimension_numbers = #tpu.dot_dimension_numbers<[1], [0], [0], [1], [0, 0, 1, 1], [], []>} : vector<32x64xbf16>, vector<64x256xbf16>, vector<32x256xf32> -> vector<32x256xf32>
    %c0_34 = arith.constant 0 : index
    %c0_35 = arith.constant 0 : index
    %109 = vector.load %arg6[%c0_34, %c0_35] : memref<1x256xf32, #tpu.memory_space<vmem>>, vector<1x256xf32>
    %110 = vector.broadcast %109 : vector<1x256xf32> to vector<32x256xf32>
    %111 = arith.addf %108, %110 : vector<32x256xf32>
    %c0_36 = arith.constant 0 : index
    %c0_37 = arith.constant 0 : index
    %112 = vector.load %arg8[%c0_36, %c0_37] : memref<32x256xf32, #tpu.memory_space<vmem>>, vector<32x256xf32>
    tpu.vector_store %arg8[%c0_36, %c0_37], %111 {strides = array<i32>} : memref<32x256xf32, #tpu.memory_space<vmem>>, vector<32x256xf32>,
    %c0_38 = arith.constant 0 : index
    %c0_39 = arith.constant 0 : index
    %113 = vector.load %arg5[%c0_38, %c0_39] : memref<64x256xbf16, #tpu.memory_space<vmem>>, vector<64x256xbf16>
    %c0_i32_40 = arith.constant 0 : i32
    %c8_i32_41 = arith.constant 8 : i32
    %114 = arith.muli %c0_i32_40, %c8_i32_41 : i32
    %115 = tpu.assume_multiple %114, 8 : i32
    %116 = arith.index_cast %115 : i32 to index
    %c0_42 = arith.constant 0 : index
    %117 = vector.load %arg8[%116, %c0_42] : memref<32x256xf32, #tpu.memory_space<vmem>>, vector<8x256xf32>
    %118 = arith.truncf %0 : vector<8x64xf32> to vector<8x64xbf16>
    %cst_43 = arith.constant dense<0.000000e+00> : vector<8x256xf32>
    %119 = tpu.matmul %118, %113, %cst_43 {dimension_numbers = #tpu.dot_dimension_numbers<[1], [0], [0], [1], [0, 0, 1, 1], [], []>} : vector<8x64xbf16>, vector<64x256xbf16>, vector<8x256xf32> -> vector<8x256xf32>
    %120 = arith.addf %117, %119 : vector<8x256xf32>
    %121 = arith.negf %120 : vector<8x256xf32>
    %122 = math.exp %121 : vector<8x256xf32>
    %cst_44 = arith.constant 1.000000e+00 : f32
    %123 = vector.broadcast %cst_44 : f32 to vector<8x256xf32>
    %124 = arith.addf %123, %122 : vector<8x256xf32>
    %125 = arith.divf %123, %124 : vector<8x256xf32>
    %126 = vector.extract_strided_slice %125 {offsets = [0, 0], sizes = [8, 64], strides = [1, 1]} : vector<8x256xf32> to vector<8x64xf32>
    %127 = vector.extract_strided_slice %125 {offsets = [0, 64], sizes = [8, 64], strides = [1, 1]} : vector<8x256xf32> to vector<8x64xf32>
    %128 = vector.extract_strided_slice %125 {offsets = [0, 192], sizes = [8, 64], strides = [1, 1]} : vector<8x256xf32> to vector<8x64xf32>
    %129 = vector.extract_strided_slice %120 {offsets = [0, 128], sizes = [8, 64], strides = [1, 1]} : vector<8x256xf32> to vector<8x64xf32>
    %130 = math.tanh %129 : vector<8x64xf32>
    %131 = arith.mulf %127, %0 : vector<8x64xf32>
    %132 = arith.mulf %126, %130 : vector<8x64xf32>
    %133 = arith.addf %131, %132 : vector<8x64xf32>
    %134 = math.tanh %133 : vector<8x64xf32>
    %135 = arith.mulf %128, %134 : vector<8x64xf32>
    %136 = arith.index_cast %115 : i32 to index
    %c0_45 = arith.constant 0 : index
    %137 = vector.load %arg7[%136, %c0_45] : memref<32x64xf32, #tpu.memory_space<vmem>>, vector<8x64xf32>
    tpu.vector_store %arg7[%136, %c0_45], %135 {strides = array<i32>} : memref<32x64xf32, #tpu.memory_space<vmem>>, vector<8x64xf32>,
    %c1_i32_46 = arith.constant 1 : i32
    %c8_i32_47 = arith.constant 8 : i32
    %138 = arith.muli %c1_i32_46, %c8_i32_47 : i32
    %139 = tpu.assume_multiple %138, 8 : i32
    %140 = arith.index_cast %139 : i32 to index
    %c0_48 = arith.constant 0 : index
    %141 = vector.load %arg8[%140, %c0_48] : memref<32x256xf32, #tpu.memory_space<vmem>>, vector<8x256xf32>
    %142 = arith.truncf %135 : vector<8x64xf32> to vector<8x64xbf16>
    %cst_49 = arith.constant dense<0.000000e+00> : vector<8x256xf32>
    %143 = tpu.matmul %142, %113, %cst_49 {dimension_numbers = #tpu.dot_dimension_numbers<[1], [0], [0], [1], [0, 0, 1, 1], [], []>} : vector<8x64xbf16>, vector<64x256xbf16>, vector<8x256xf32> -> vector<8x256xf32>
    %144 = arith.addf %141, %143 : vector<8x256xf32>
    %145 = arith.negf %144 : vector<8x256xf32>
    %146 = math.exp %145 : vector<8x256xf32>
    %cst_50 = arith.constant 1.000000e+00 : f32
    %147 = vector.broadcast %cst_50 : f32 to vector<8x256xf32>
    %148 = arith.addf %147, %146 : vector<8x256xf32>
    %149 = arith.divf %147, %148 : vector<8x256xf32>
    %150 = vector.extract_strided_slice %149 {offsets = [0, 0], sizes = [8, 64], strides = [1, 1]} : vector<8x256xf32> to vector<8x64xf32>
    %151 = vector.extract_strided_slice %149 {offsets = [0, 64], sizes = [8, 64], strides = [1, 1]} : vector<8x256xf32> to vector<8x64xf32>
    %152 = vector.extract_strided_slice %149 {offsets = [0, 192], sizes = [8, 64], strides = [1, 1]} : vector<8x256xf32> to vector<8x64xf32>
    %153 = vector.extract_strided_slice %144 {offsets = [0, 128], sizes = [8, 64], strides = [1, 1]} : vector<8x256xf32> to vector<8x64xf32>
    %154 = math.tanh %153 : vector<8x64xf32>
    %155 = arith.mulf %151, %133 : vector<8x64xf32>
    %156 = arith.mulf %150, %154 : vector<8x64xf32>
    %157 = arith.addf %155, %156 : vector<8x64xf32>
    %158 = math.tanh %157 : vector<8x64xf32>
    %159 = arith.mulf %152, %158 : vector<8x64xf32>
    %160 = arith.index_cast %139 : i32 to index
    %c0_51 = arith.constant 0 : index
    %161 = vector.load %arg7[%160, %c0_51] : memref<32x64xf32, #tpu.memory_space<vmem>>, vector<8x64xf32>
    tpu.vector_store %arg7[%160, %c0_51], %159 {strides = array<i32>} : memref<32x64xf32, #tpu.memory_space<vmem>>, vector<8x64xf32>,
    %c2_i32_52 = arith.constant 2 : i32
    %c8_i32_53 = arith.constant 8 : i32
    %162 = arith.muli %c2_i32_52, %c8_i32_53 : i32
    %163 = tpu.assume_multiple %162, 8 : i32
    %164 = arith.index_cast %163 : i32 to index
    %c0_54 = arith.constant 0 : index
    %165 = vector.load %arg8[%164, %c0_54] : memref<32x256xf32, #tpu.memory_space<vmem>>, vector<8x256xf32>
    %166 = arith.truncf %159 : vector<8x64xf32> to vector<8x64xbf16>
    %cst_55 = arith.constant dense<0.000000e+00> : vector<8x256xf32>
    %167 = tpu.matmul %166, %113, %cst_55 {dimension_numbers = #tpu.dot_dimension_numbers<[1], [0], [0], [1], [0, 0, 1, 1], [], []>} : vector<8x64xbf16>, vector<64x256xbf16>, vector<8x256xf32> -> vector<8x256xf32>
    %168 = arith.addf %165, %167 : vector<8x256xf32>
    %169 = arith.negf %168 : vector<8x256xf32>
    %170 = math.exp %169 : vector<8x256xf32>
    %cst_56 = arith.constant 1.000000e+00 : f32
    %171 = vector.broadcast %cst_56 : f32 to vector<8x256xf32>
    %172 = arith.addf %171, %170 : vector<8x256xf32>
    %173 = arith.divf %171, %172 : vector<8x256xf32>
    %174 = vector.extract_strided_slice %173 {offsets = [0, 0], sizes = [8, 64], strides = [1, 1]} : vector<8x256xf32> to vector<8x64xf32>
    %175 = vector.extract_strided_slice %173 {offsets = [0, 64], sizes = [8, 64], strides = [1, 1]} : vector<8x256xf32> to vector<8x64xf32>
    %176 = vector.extract_strided_slice %173 {offsets = [0, 192], sizes = [8, 64], strides = [1, 1]} : vector<8x256xf32> to vector<8x64xf32>
    %177 = vector.extract_strided_slice %168 {offsets = [0, 128], sizes = [8, 64], strides = [1, 1]} : vector<8x256xf32> to vector<8x64xf32>
    %178 = math.tanh %177 : vector<8x64xf32>
    %179 = arith.mulf %175, %157 : vector<8x64xf32>
    %180 = arith.mulf %174, %178 : vector<8x64xf32>
    %181 = arith.addf %179, %180 : vector<8x64xf32>
    %182 = math.tanh %181 : vector<8x64xf32>
    %183 = arith.mulf %176, %182 : vector<8x64xf32>
    %184 = arith.index_cast %163 : i32 to index
    %c0_57 = arith.constant 0 : index
    %185 = vector.load %arg7[%184, %c0_57] : memref<32x64xf32, #tpu.memory_space<vmem>>, vector<8x64xf32>
    tpu.vector_store %arg7[%184, %c0_57], %183 {strides = array<i32>} : memref<32x64xf32, #tpu.memory_space<vmem>>, vector<8x64xf32>,
    %c3_i32_58 = arith.constant 3 : i32
    %c8_i32_59 = arith.constant 8 : i32
    %186 = arith.muli %c3_i32_58, %c8_i32_59 : i32
    %187 = tpu.assume_multiple %186, 8 : i32
    %188 = arith.index_cast %187 : i32 to index
    %c0_60 = arith.constant 0 : index
    %189 = vector.load %arg8[%188, %c0_60] : memref<32x256xf32, #tpu.memory_space<vmem>>, vector<8x256xf32>
    %190 = arith.truncf %183 : vector<8x64xf32> to vector<8x64xbf16>
    %cst_61 = arith.constant dense<0.000000e+00> : vector<8x256xf32>
    %191 = tpu.matmul %190, %113, %cst_61 {dimension_numbers = #tpu.dot_dimension_numbers<[1], [0], [0], [1], [0, 0, 1, 1], [], []>} : vector<8x64xbf16>, vector<64x256xbf16>, vector<8x256xf32> -> vector<8x256xf32>
    %192 = arith.addf %189, %191 : vector<8x256xf32>
    %193 = arith.negf %192 : vector<8x256xf32>
    %194 = math.exp %193 : vector<8x256xf32>
    %cst_62 = arith.constant 1.000000e+00 : f32
    %195 = vector.broadcast %cst_62 : f32 to vector<8x256xf32>
    %196 = arith.addf %195, %194 : vector<8x256xf32>
    %197 = arith.divf %195, %196 : vector<8x256xf32>
    %198 = vector.extract_strided_slice %197 {offsets = [0, 0], sizes = [8, 64], strides = [1, 1]} : vector<8x256xf32> to vector<8x64xf32>
    %199 = vector.extract_strided_slice %197 {offsets = [0, 64], sizes = [8, 64], strides = [1, 1]} : vector<8x256xf32> to vector<8x64xf32>
    %200 = vector.extract_strided_slice %197 {offsets = [0, 192], sizes = [8, 64], strides = [1, 1]} : vector<8x256xf32> to vector<8x64xf32>
    %201 = vector.extract_strided_slice %192 {offsets = [0, 128], sizes = [8, 64], strides = [1, 1]} : vector<8x256xf32> to vector<8x64xf32>
    %202 = math.tanh %201 : vector<8x64xf32>
    %203 = arith.mulf %199, %181 : vector<8x64xf32>
    %204 = arith.mulf %198, %202 : vector<8x64xf32>
    %205 = arith.addf %203, %204 : vector<8x64xf32>
    %206 = math.tanh %205 : vector<8x64xf32>
    %207 = arith.mulf %200, %206 : vector<8x64xf32>
    %208 = arith.index_cast %187 : i32 to index
    %c0_63 = arith.constant 0 : index
    %209 = vector.load %arg7[%208, %c0_63] : memref<32x64xf32, #tpu.memory_space<vmem>>, vector<8x64xf32>
    tpu.vector_store %arg7[%208, %c0_63], %207 {strides = array<i32>} : memref<32x64xf32, #tpu.memory_space<vmem>>, vector<8x64xf32>,
    %c4_i32_64 = arith.constant 4 : i32
    return
  }
}

</mosaic_0001>

<bundles_post_ra>
// kernel: dual_lstm_decoder_adapter.1
= control target key start
LH: loop header
LB: loop body
LE: loop exit
PB: predicated region body
PF: predicated region fallthrough
CT: control target
= control target key end

     0   :  { %12 = vsyncpa [#allocation4], 0  ;;  %s1826_s0 = inlined_call_operand.vmem [shape: bf16[32,64], index: 0, kind: input, shape index: {}]   ;;  %s1827_s1 = inlined_call_operand.vmem [shape: bf16[64,256], index: 1, kind: input, shape index: {}]   ;;  %s1828_s2 = inlined_call_operand.hbm [shape: bf16[64,256], index: 2, kind: input, shape index: {}]   ;;  %s1829_s3 = inlined_call_operand.vmem [shape: f32[1,256], index: 3, kind: input, shape index: {}]   ;;  %s1830_s4 = inlined_call_operand.hbm [shape: bf16[64,256], index: 4, kind: input, shape index: {}]   ;;  %s1831_s5 = inlined_call_operand.hbm [shape: bf16[64,256], index: 5, kind: input, shape index: {}]   ;;  %s1832_s6 = inlined_call_operand.vmem [shape: f32[1,256], index: 6, kind: input, shape index: {}]   ;;  %s1833_s7 = inlined_call_operand.vmem [shape: f32[32,64], index: 7, kind: output, shape index: {}]  }
   0x1   :  { %13 = vsyncpa [#allocation6], 0  ;;  %s37_s26 = sshll.u32 %s1830_s4, 4  ;;  %s1527_s27 = smov [#allocation5]   ;;  %s38_s26 = int_to_ptr.hbm [resolvable:$true] %s37_s26 }
   0x2   :  { %s39_s28 = sshll.u32 %s1527_s27, 4  ;;  %s22_s8 = sshll.u32 %s1828_s2, 4  ;;  %s40_s28 = int_to_ptr.vmem [resolvable:$true] %s39_s28  ;;  %s23_s8 = int_to_ptr.hbm [resolvable:$true] %s22_s8 }
   0x3   :  { %s1528_s9 = smov 128   ;;  %s1529_s10 = smov 8  }
   0x4   :  { %45 = dma.hbm_to_vmem [thread:$0]  %s38_s26, 1024, %s40_s28, [#allocation6], %s1528_s9, %s1528_s9, %s1529_s10  }
   0x5   :  { %s1530_s11 = smov [#allocation3]   ;;  %s50_s15 = sshll.u32 %s1831_s5, 4  ;;  %s51_s15 = int_to_ptr.hbm [resolvable:$true] %s50_s15 }
   0x6   :  { %s24_s12 = sshll.u32 %s1530_s11, 4  ;;  %s1531_s4 = smov [#allocation7]   ;;  %s25_s12 = int_to_ptr.vmem [resolvable:$true] %s24_s12 }
   0x7   :  { %30 = dma.hbm_to_vmem [thread:$0]  %s23_s8, 1024, %s25_s12, [#allocation4], %s1528_s9, %s1528_s9, %s1529_s10  }
   0x8   :  { %s52_s16 = sshll.u32 %s1531_s4, 4  ;;  %s53_s16 = int_to_ptr.vmem [resolvable:$true] %s52_s16 }
   0x9   :  { %58 = dma.hbm_to_vmem [thread:$0]  %s51_s15, 1024, %s53_s16, [#allocation6], %s1528_s9, %s1528_s9, %s1529_s10  }
   0xa   :  { %1523 = dma.done.wait [#allocation4], 1024  }
   0xb   :  { %1524 = vsyncadd [#allocation4], 4294966272 }
   0xc   :  { %1525 = dma.done.wait [#allocation6], 2048  }
   0xd   :  { %1526 = vsyncadd [#allocation6], 4294965248  ;;  %v1170_v0 = vld [vmem:[%s1827_s1 + $0x30] sm:$0xf]  ;;  %v1323_v1 = vld [vmem:[%s1827_s1 + $0x34] sm:$0xf0] }
   0xe   :  { %v1206_v2 = vld [vmem:[#allocation3 + $0x30] sm:$0xf]  ;;  %v1171_v3 = vor.u32 %v1323_v1, %v1170_v0  ;;  %v1331_v4 = vld [vmem:[#allocation3 + $0x34] sm:$0xf0]  ;;  %v1162_v5 = vld [vmem:[%s1827_s1 + $0x20] sm:$0xf] }
   0xf   :  { %v1321_v6 = vld [vmem:[%s1827_s1 + $0x24] sm:$0xf0]  ;;  %v1595_v7 = vor.u32 %v1331_v4, %v1206_v2  ;;  %v1198_v8 = vld [vmem:[#allocation3 + $0x20] sm:$0xf]  ;;  %v1154_v11 = vld [vmem:[%s1827_s1 + $0x10] sm:$0xf] }
  0x10   :  { %v1329_v9 = vld [vmem:[#allocation3 + $0x24] sm:$0xf0]  ;;  %153 = vmatpush.bf16.msra.mxu0 %v1171_v3  ;;  %v1163_v10 = vor.u32 %v1321_v6, %v1162_v5  ;;  %v1319_v12 = vld [vmem:[%s1827_s1 + $0x14] sm:$0xf0]  ;;  %v1190_v14 = vld [vmem:[#allocation3 + $0x10] sm:$0xf] }
  0x11   :  { %255 = vmatpush.bf16.msra.mxu2 %v1595_v7  ;;  %v1604_v13 = vor.u32 %v1329_v9, %v1198_v8  ;;  %v1330_v15 = vld [vmem:[#allocation3 + $0x34] sm:$0xf]  ;;  %v1208_v16 = vld [vmem:[#allocation3 + $0x38] sm:$0xf0]  ;;  %v1327_v17 = vld [vmem:[#allocation3 + $0x14] sm:$0xf0]  ;;  %v1155_v25 = vor.u32 %v1319_v12, %v1154_v11 }
  0x12   :  { %v1606_v18 = vor.u32 %v1330_v15, %v1208_v16  ;;  %v1322_v19 = vld [vmem:[%s1827_s1 + $0x34] sm:$0xf]  ;;  %v1172_v20 = vld [vmem:[%s1827_s1 + $0x38] sm:$0xf0]  ;;  %v1146_v21 = vld [vmem:[%s1827_s1] sm:$0xf]  ;;  %v1191_v29 = vor.u32 %v1327_v17, %v1190_v14 }
  0x13   :  { %v1317_v22 = vld [vmem:[%s1827_s1 + $0x4] sm:$0xf0]  ;;  %v1175_v23 = vor.u32 %v1322_v19, %v1172_v20  ;;  %v1328_v24 = vld [vmem:[#allocation3 + $0x24] sm:$0xf]  ;;  %v1182_v26 = vld [vmem:[#allocation3] sm:$0xf] }
  0x14   :  { %154 = vmatpush.bf16.msra.mxu0 %v1163_v10  ;;  %268 = vmatpush.bf16.msra.mxu3 %v1606_v18  ;;  %v1200_v27 = vld [vmem:[#allocation3 + $0x28] sm:$0xf0]  ;;  %v1320_v28 = vld [vmem:[%s1827_s1 + $0x24] sm:$0xf]  ;;  %v1326_v32 = vld [vmem:[#allocation3 + $0x14] sm:$0xf]  ;;  %v1147_v38 = vor.u32 %v1317_v22, %v1146_v21 }
  0x15   :  { %256 = vmatpush.bf16.msra.mxu2 %v1604_v13  ;;  %172 = vmatpush.bf16.msra.mxu1 %v1175_v23  ;;  %v1203_v30 = vor.u32 %v1328_v24, %v1200_v27  ;;  %v1164_v31 = vld [vmem:[%s1827_s1 + $0x28] sm:$0xf0]  ;;  %v1192_v33 = vld [vmem:[#allocation3 + $0x18] sm:$0xf0]  ;;  %v1325_v34 = vld [vmem:[#allocation3 + $0x4] sm:$0xf0] }
  0x16   :  { %v1167_v35 = vor.u32 %v1320_v28, %v1164_v31  ;;  %v1318_v36 = vld [vmem:[%s1827_s1 + $0x14] sm:$0xf]  ;;  %v1156_v37 = vld [vmem:[%s1827_s1 + $0x18] sm:$0xf0]  ;;  %v1195_v39 = vor.u32 %v1326_v32, %v1192_v33  ;;  %v1183_v40 = vor.u32 %v1325_v34, %v1182_v26  ;;  %v1324_v42 = vld [vmem:[#allocation3 + $0x4] sm:$0xf] }
  0x17   :  { %v1159_v41 = vor.u32 %v1318_v36, %v1156_v37  ;;  %v1184_v43 = vld [vmem:[#allocation3 + $0x8] sm:$0xf0]  ;;  %v1316_v44 = vld [vmem:[%s1827_s1 + $0x4] sm:$0xf]  ;;  %vm142_vm0 = vcmask 523264   ;;  %v1532_v49 = vmov 0  }
  0x18   :  { %155 = vmatpush.bf16.msra.mxu0 %v1155_v25  ;;  %269 = vmatpush.bf16.msra.mxu3 %v1203_v30  ;;  %v1148_v45 = vld [vmem:[%s1827_s1 + $0x8] sm:$0xf0]  ;;  %v1314_v46 = vld [vmem:[%s1826_s0] sm:$0xff]  ;;  %v1187_v47 = vor.u32 %v1324_v42, %v1184_v43 }
  0x19   :  { %257 = vmatpush.bf16.msra.mxu2 %v1191_v29  ;;  %173 = vmatpush.bf16.msra.mxu1 %v1167_v35  ;;  %v1151_v48 = vor.u32 %v1316_v44, %v1148_v45  ;;  %v86_v50 = vld [vmem:[%s1829_s3] sm:$0x3]  ;;  %s1533_s3 = smov 64  }
  0x1a   :  { %v1659_v51 = vperm.slane %v86_v50, 0  ;;  %v1662_v62 = vperm.slane %v86_v50, 1 }
  0x1c   :  { %156 = vmatpush.bf16.msra.mxu0 %v1147_v38  ;;  %270 = vmatpush.bf16.msra.mxu3 %v1195_v39 }
  0x1d   :  { %258 = vmatpush.bf16.msra.mxu2 %v1183_v40  ;;  %174 = vmatpush.bf16.msra.mxu1 %v1159_v41 }
  0x1f   :  { %1176 = vmatmul.msk.bf16.vlgmr.msra.gmra.mxu0 %vm142_vm0, %v1314_v46 }
  0x20   :  { %442 = vmatpush.bf16.msrb.mxu0 %v1595_v7  ;;  %259 = vmatmul.bf16.vlgmr.msra.gmra.mxu2 %v1532_v49 }
  0x21   :  { %348 = vmatpush.bf16.msrb.mxu2 %v1595_v7  ;;  %271 = vmatpush.bf16.msra.mxu3 %v1187_v47 }
  0x22   :  { %175 = vmatpush.bf16.msra.mxu1 %v1151_v48 }
  0x24   :  { %443 = vmatpush.bf16.msrb.mxu0 %v1604_v13  ;;  %272 = vmatmul.bf16.vlgmr.msra.gmra.mxu3 %v1532_v49 }
  0x25   :  { %361 = vmatpush.bf16.msrb.mxu3 %v1606_v18  ;;  %349 = vmatpush.bf16.msrb.mxu2 %v1604_v13 }
  0x26   :  { %455 = vmatpush.bf16.msrb.mxu1 %v1606_v18 }
  0x27   :  { %1178 = vmatmul.msk.bf16.vlgmr.msra.gmra.mxu1 %vm142_vm0, %v1314_v46 }
  0x28   :  { %444 = vmatpush.bf16.msrb.mxu0 %v1191_v29 }
  0x29   :  { %362 = vmatpush.bf16.msrb.mxu3 %v1203_v30  ;;  %350 = vmatpush.bf16.msrb.mxu2 %v1191_v29 }
  0x2a   :  { %456 = vmatpush.bf16.msrb.mxu1 %v1203_v30 }
  0x2c   :  { %445 = vmatpush.bf16.msrb.mxu0 %v1183_v40 }
  0x2d   :  { %363 = vmatpush.bf16.msrb.mxu3 %v1195_v39  ;;  %351 = vmatpush.bf16.msrb.mxu2 %v1183_v40 }
  0x2e   :  { %457 = vmatpush.bf16.msrb.mxu1 %v1195_v39 }
  0x31   :  { %536 = vmatpush.bf16.msra.mxu2 %v1595_v7  ;;  %364 = vmatpush.bf16.msrb.mxu3 %v1187_v47 }
  0x32   :  { %458 = vmatpush.bf16.msrb.mxu1 %v1187_v47 }
  0x35   :  { %549 = vmatpush.bf16.msra.mxu3 %v1606_v18  ;;  %537 = vmatpush.bf16.msra.mxu2 %v1604_v13 }
  0x39   :  { %550 = vmatpush.bf16.msra.mxu3 %v1203_v30  ;;  %538 = vmatpush.bf16.msra.mxu2 %v1191_v29 }
  0x3d   :  { %551 = vmatpush.bf16.msra.mxu3 %v1195_v39  ;;  %539 = vmatpush.bf16.msra.mxu2 %v1183_v40 }
  0x41   :  { %552 = vmatpush.bf16.msra.mxu3 %v1187_v47 }
  0x9c   :  { %v158_v52 = vpop.f32.mrf.mxu0 }
  0x9d   :  { %v159_v53 = vadd.f32 %v158_v52, %v1659_v51 }
  0xa3   :  { %v260_v54 = vpop.f32.mrf.mxu2 }
  0xa4   :  { %v277_v55 = vadd.f32 %v260_v54, %v159_v53  ;;  %v177_v63 = vpop.f32.mrf.mxu1  ;;  %v160_v35 = vpop.f32.mrf.mxu0 }
  0xa5   :  { %v178_v0 = vadd.f32 %v177_v63, %v1662_v62  ;;  %v161_v36 = vadd.f32 %v160_v35, %v1659_v51  ;;  %v1241_v35 = vld [vmem:[#allocation5 + $0x18] sm:$0xf0] }
  0xa6   :  { %v1212_v56 = vmul.f32 -1.442695, %v277_v55 }
  0xa7   :  { %v273_v57 = vpop.f32.mrf.mxu3 }
  0xa8   :  { %1355 = vpow2.f32 %v1212_v56  ;;  %v278_v2 = vadd.f32 %v273_v57, %v178_v0 }
  0xaa   :  { %v1213_v14 = vmul.f32 -1.442695, %v278_v2 }
  0xab   :  { %v262_v58 = vpop.f32.mrf.mxu2 }
  0xac   :  { %v179_v45 = vpop.f32.mrf.mxu1 }
  0xad   :  { %v180_v46 = vadd.f32 %v179_v45, %v1662_v62 }
  0xae   :  { %v1356_v59 = vpop.eup %1355 }
  0xaf   :  { %v275_v60 = vpop.f32.mrf.mxu3  ;;  %v285_v61 = vadd.f32 1.0, %v1356_v59 }
  0xb1   :  { %1357 = vrcp.f32 %v285_v61  ;;  %v298_v5 = vand.u32 2147483648, %v285_v61  ;;  %v296_v7 = vand.u32 2147483647, %v285_v61  ;;  %vm292_vm2 = vweird.f32 %v285_v61 }
  0xb2   :  { %1359 = vtanh.f32 %v278_v2 }
  0xb3   :  { %v299_v10 = vor.u32 1.1754944e-38, %v298_v5  ;;  %vm297_vm4 = vcmp.eq.f32.partialorder %v296_v7, 8.507059e+37  ;;  %1361 = vpow2.f32 %v1213_v14 }
  0xb7   :  { %v1358_v1 = vpop.eup %1357 }
  0xb8   :  { %v288_v3 = vmul.f32 %v1358_v1, %v285_v61  ;;  %vm293_vm1 = vweird.f32 %v1358_v1  ;;  %v1360_v9 = vpop.eup %1359 }
  0xb9   :  { %vm294_vm3 = vmor %vm292_vm2, %vm293_vm1  ;;  %v1362_v15 = vpop.eup %1361 }
  0xba   :  { %v289_v4 = vsub.f32 1.0, %v288_v3  ;;  %v286_v16 = vadd.f32 1.0, %v1362_v15 }
  0xbc   :  { %v290_v6 = vmul.f32 %v1358_v1, %v289_v4  ;;  %1363 = vrcp.f32 %v286_v16  ;;  %vm307_vm5 = vweird.f32 %v286_v16  ;;  %v313_v24 = vand.u32 2147483648, %v286_v16  ;;  %v1315_v4 = vld [vmem:[%s1826_s0 + $0x8] sm:$0xff] }
  0xbd   :  { %v311_v26 = vand.u32 2147483647, %v286_v16  ;;  %1177 = vmatmul.msk.bf16.gmra.mxu0 %vm142_vm0, %v1315_v4  ;;  %1179 = vmatmul.msk.bf16.gmra.mxu1 %vm142_vm0, %v1315_v4 }
  0xbe   :  { %v291_v8 = vadd.f32 %v1358_v1, %v290_v6  ;;  %v314_v27 = vor.u32 1.1754944e-38, %v313_v24  ;;  %v1247_v24 = vld [vmem:[#allocation5 + $0x20] sm:$0xf] }
  0xbf   :  { %vm312_vm8 = vcmp.eq.f32.partialorder %v311_v26, 8.507059e+37 }
  0xc0   :  { %v295_v11 = vsel %vm294_vm3, %v1358_v1, %v291_v8 }
  0xc1   :  { %v300_v12 = vsel %vm297_vm4, %v299_v10, %v295_v11 }
  0xc2   :  { %v319_v13 = vmul.f32 %v1360_v9, %v300_v12  ;;  %v1364_v17 = vpop.eup %1363  ;;  %v318_v21 = vmul.f32 0.0, %v300_v12 }
  0xc3   :  { %v303_v18 = vmul.f32 %v1364_v17, %v286_v16  ;;  %vm308_vm6 = vweird.f32 %v1364_v17 }
  0xc4   :  { %321 = vrot.lane.b32.xlu0 %v319_v13, %s1533_s3  ;;  %vm309_vm7 = vmor %vm307_vm5, %vm308_vm6 }
  0xc5   :  { %v304_v19 = vsub.f32 1.0, %v303_v18 }
  0xc7   :  { %v305_v20 = vmul.f32 %v1364_v17, %v304_v19  ;;  %v1255_v19 = vld [vmem:[#allocation5 + $0x30] sm:$0xf] }
  0xc9   :  { %v306_v25 = vadd.f32 %v1364_v17, %v305_v20  ;;  %v1339_v20 = vld [vmem:[#allocation5 + $0x34] sm:$0xf0] }
  0xcb   :  { %v310_v28 = vsel %vm309_vm7, %v1364_v17, %v306_v25  ;;  %v1337_v25 = vld [vmem:[#allocation5 + $0x24] sm:$0xf0] }
  0xcc   :  { %v315_v30 = vsel %vm312_vm8, %v314_v27, %v310_v28  ;;  %v1336_v27 = vld [vmem:[#allocation5 + $0x24] sm:$0xf]  ;;  %v1249_v28 = vld [vmem:[#allocation5 + $0x28] sm:$0xf0] }
 0x136   :  { %v322_v22 = vpop.permute.xlu0 %321 }
 0x137   :  { %v1666_v23 = vadd.f32 %v322_v22, %v318_v21  ;;  %v1338_v21 = vld [vmem:[#allocation5 + $0x34] sm:$0xf]  ;;  %v1256_v22 = vor.u32 %v1339_v20, %v1255_v19 }
 0x139   :  { %1365 = vtanh.f32 %v1666_v23  ;;  %684 = vmatpush.bf16.msra.mxu0 %v1256_v22 }
 0x13f   :  { %v1366_v29 = vpop.eup %1365 }
 0x140   :  { %v326_v31 = vmul.f32 %v1366_v29, %v315_v30  ;;  %v1248_v29 = vor.u32 %v1337_v25, %v1247_v24  ;;  %v1252_v30 = vor.u32 %v1336_v27, %v1249_v28 }
 0x142   :  { %v337_v32 = vpack.c.bf16 %v326_v31, %v326_v31  ;;  %685 = vmatpush.bf16.msra.mxu0 %v1248_v29 }
 0x144   :  { %339 = vrot.lane.b32.xlu0 %v337_v32, %s1533_s3  ;;  %v1335_v32 = vld [vmem:[#allocation5 + $0x14] sm:$0xf0] }
 0x14c   :  { %328 = vrot.lane.b32.xlu0 %v326_v31, %s1533_s3  ;;  %v1239_v31 = vld [vmem:[#allocation5 + $0x10] sm:$0xf] }
 0x1b6   :  { %v340_v33 = vpop.permute.xlu0 %339 }
 0x1b7   :  { %1214 = vmatmul.msk.bf16.vlgmr.msrb.gmra.mxu2 %vm142_vm0, %v340_v33  ;;  %1215 = vmatmul.msk.bf16.vlgmr.msrb.gmra.mxu3 %vm142_vm0, %v340_v33  ;;  %v1334_v33 = vld [vmem:[#allocation5 + $0x14] sm:$0xf] }
 0x1be   :  { %v329_v34 = vpop.permute.xlu0 %328 }
 0x1bf   :  { %331 = vst.msk [vmem:[%s1833_s7] sm:$0xff] %vm142_vm0, %v329_v34  ;;  %v1240_v34 = vor.u32 %v1335_v32, %v1239_v31 }
 0x1c1   :  { %686 = vmatpush.bf16.msra.mxu0 %v1240_v34  ;;  %v1347_v34 = vld [vmem:[#allocation7 + $0x34] sm:$0xf0] }
 0x1c6   :  { %v614_v45 = vld [vmem:[%s1833_s7] sm:$0xff] }
 0x23a   :  { %v353_v37 = vpop.f32.mrf.mxu2  ;;  %v366_v38 = vpop.f32.mrf.mxu3 }
 0x23b   :  { %v370_v39 = vadd.f32 %v353_v37, %v161_v36  ;;  %v371_v48 = vadd.f32 %v366_v38, %v180_v46  ;;  %v1231_v36 = vld [vmem:[#allocation5] sm:$0xf]  ;;  %v1333_v37 = vld [vmem:[#allocation5 + $0x4] sm:$0xf0]  ;;  %v1244_v38 = vor.u32 %v1334_v33, %v1241_v35  ;;  %v1291_v33 = vld [vmem:[#allocation7 + $0x30] sm:$0xf] }
 0x23c   :  { %v1346_v35 = vld [vmem:[#allocation7 + $0x34] sm:$0xf] }
 0x23d   :  { %v1216_v40 = vmul.f32 -1.442695, %v370_v39  ;;  %v1217_v63 = vmul.f32 -1.442695, %v371_v48  ;;  %v1332_v39 = vld [vmem:[#allocation5 + $0x4] sm:$0xf] }
 0x23f   :  { %1367 = vpow2.f32 %v1216_v40  ;;  %v1233_v40 = vld [vmem:[#allocation5 + $0x8] sm:$0xf0] }
 0x242   :  { %v355_v41 = vpop.f32.mrf.mxu2  ;;  %v368_v42 = vpop.f32.mrf.mxu3 }
 0x243   :  { %v1232_v41 = vor.u32 %v1333_v37, %v1231_v36  ;;  %v1236_v42 = vor.u32 %v1332_v39, %v1233_v40  ;;  %v1292_v36 = vor.u32 %v1347_v34, %v1291_v33  ;;  %v1293_v37 = vld [vmem:[#allocation7 + $0x38] sm:$0xf0]  ;;  %v1345_v39 = vld [vmem:[#allocation7 + $0x24] sm:$0xf0] }
 0x244   :  { %v1296_v40 = vor.u32 %v1346_v35, %v1293_v37 }
 0x245   :  { %v1368_v43 = vpop.eup %1367  ;;  %687 = vmatpush.bf16.msra.mxu0 %v1232_v41  ;;  %v1344_v41 = vld [vmem:[#allocation7 + $0x24] sm:$0xf]  ;;  %780 = vmatpush.bf16.msrb.mxu2 %v1292_v36 }
 0x246   :  { %v378_v44 = vadd.f32 1.0, %v1368_v43  ;;  %793 = vmatpush.bf16.msrb.mxu3 %v1296_v40 }
 0x248   :  { %1369 = vrcp.f32 %v378_v44  ;;  %v391_v53 = vand.u32 2147483648, %v378_v44  ;;  %v389_v55 = vand.u32 2147483647, %v378_v44  ;;  %vm385_vm10 = vweird.f32 %v378_v44 }
 0x249   :  { %1371 = vtanh.f32 %v371_v48  ;;  %v182_v48 = vpop.f32.mrf.mxu1 }
 0x24a   :  { %v392_v57 = vor.u32 1.1754944e-38, %v391_v53  ;;  %vm390_vm12 = vcmp.eq.f32.partialorder %v389_v55, 8.507059e+37  ;;  %1373 = vpow2.f32 %v1217_v63 }
 0x24e   :  { %v1370_v47 = vpop.eup %1369 }
 0x24f   :  { %v381_v50 = vmul.f32 %v1370_v47, %v378_v44  ;;  %vm386_vm9 = vweird.f32 %v1370_v47  ;;  %v1372_v59 = vpop.eup %1371 }
 0x250   :  { %vm387_vm11 = vmor %vm385_vm10, %vm386_vm9  ;;  %v1374_v0 = vpop.eup %1373 }
 0x251   :  { %v382_v52 = vsub.f32 1.0, %v381_v50  ;;  %v379_v1 = vadd.f32 1.0, %v1374_v0  ;;  %v163_v50 = vpop.f32.mrf.mxu0  ;;  %v183_v0 = vadd.f32 %v182_v48, %v1662_v62  ;;  %v1277_v48 = vld [vmem:[#allocation7 + $0x18] sm:$0xf0] }
 0x253   :  { %v383_v54 = vmul.f32 %v1370_v47, %v382_v52  ;;  %1375 = vrcp.f32 %v379_v1  ;;  %v406_v11 = vand.u32 2147483648, %v379_v1  ;;  %vm400_vm14 = vweird.f32 %v379_v1  ;;  %v1705_v52 = vpop.f32.mrf.mxu1 }
 0x254   :  { %v404_v12 = vand.u32 2147483647, %v379_v1 }
 0x255   :  { %v384_v56 = vadd.f32 %v1370_v47, %v383_v54  ;;  %v407_v14 = vor.u32 1.1754944e-38, %v406_v11  ;;  %v164_v54 = vadd.f32 %v163_v50, %v1659_v51 }
 0x256   :  { %vm405_vm1 = vcmp.eq.f32.partialorder %v404_v12, 8.507059e+37 }
 0x257   :  { %v388_v58 = vsel %vm387_vm11, %v1370_v47, %v384_v56 }
 0x258   :  { %v393_v60 = vsel %vm390_vm12, %v392_v57, %v388_v58 }
 0x259   :  { %v412_v61 = vmul.f32 %v1372_v59, %v393_v60  ;;  %v1376_v2 = vpop.eup %1375  ;;  %v411_v7 = vmul.f32 %v393_v60, %v1666_v23  ;;  %v1257_v23 = vld [vmem:[#allocation5 + $0x38] sm:$0xf0]  ;;  %v1707_v53 = vpop.f32.mrf.mxu0 }
 0x25a   :  { %v396_v3 = vmul.f32 %v1376_v2, %v379_v1  ;;  %vm401_vm13 = vweird.f32 %v1376_v2  ;;  %v1260_v26 = vor.u32 %v1338_v21, %v1257_v23 }
 0x25b   :  { %414 = vrot.lane.b32.xlu1 %v412_v61, %s1533_s3  ;;  %vm402_vm15 = vmor %vm400_vm14, %vm401_vm13 }
 0x25c   :  { %v397_v5 = vsub.f32 1.0, %v396_v3  ;;  %703 = vmatpush.bf16.msra.mxu1 %v1260_v26 }
 0x25e   :  { %v398_v6 = vmul.f32 %v1376_v2, %v397_v5 }
 0x260   :  { %v399_v10 = vadd.f32 %v1376_v2, %v398_v6  ;;  %704 = vmatpush.bf16.msra.mxu1 %v1252_v30 }
 0x262   :  { %v403_v13 = vsel %vm402_vm15, %v1376_v2, %v399_v10 }
 0x263   :  { %v408_v16 = vsel %vm405_vm1, %v407_v14, %v403_v13 }
 0x264   :  { %705 = vmatpush.bf16.msra.mxu1 %v1244_v38  ;;  %v1283_v38 = vld [vmem:[#allocation7 + $0x20] sm:$0xf] }
 0x268   :  { %706 = vmatpush.bf16.msra.mxu1 %v1236_v42  ;;  %v1285_v42 = vld [vmem:[#allocation7 + $0x28] sm:$0xf0] }
 0x2cd   :  { %v415_v8 = vpop.permute.xlu1 %414 }
 0x2ce   :  { %v1686_v9 = vadd.f32 %v415_v8, %v411_v7 }
 0x2d0   :  { %1377 = vtanh.f32 %v1686_v9 }
 0x2d6   :  { %v1378_v15 = vpop.eup %1377 }
 0x2d7   :  { %v419_v17 = vmul.f32 %v1378_v15, %v408_v16 }
 0x2d9   :  { %v431_v18 = vpack.c.bf16 %v419_v17, %v419_v17 }
 0x2db   :  { %433 = vrot.lane.b32.xlu1 %v431_v18, %s1533_s3 }
 0x2e3   :  { %421 = vrot.lane.b32.xlu1 %v419_v17, %s1533_s3 }
 0x34d   :  { %v434_v43 = vpop.permute.xlu1 %433 }
 0x34e   :  { %1219 = vmatmul.msk.bf16.vlgmr.msrb.gmra.mxu0 %vm142_vm0, %v434_v43  ;;  %1220 = vmatmul.msk.bf16.vlgmr.msrb.gmra.mxu1 %vm142_vm0, %v434_v43  ;;  %v1284_v43 = vor.u32 %v1345_v39, %v1283_v38 }
 0x34f   :  { %960 = vmatpush.bf16.msrb.mxu0 %v1292_v36  ;;  %973 = vmatpush.bf16.msrb.mxu1 %v1296_v40 }
 0x350   :  { %781 = vmatpush.bf16.msrb.mxu2 %v1284_v43 }
 0x353   :  { %961 = vmatpush.bf16.msrb.mxu0 %v1284_v43 }
 0x355   :  { %v422_v44 = vpop.permute.xlu1 %421 }
 0x356   :  { %1218 = vst.msk [vmem:[%s1833_s7 + $0x8] sm:$0xff] %vm142_vm0, %v422_v44  ;;  %v1288_v44 = vor.u32 %v1344_v41, %v1285_v42 }
 0x358   :  { %794 = vmatpush.bf16.msrb.mxu3 %v1288_v44  ;;  %974 = vmatpush.bf16.msrb.mxu1 %v1288_v44 }
 0x35d   :  { %v615_v46 = vld [vmem:[%s1833_s7 + $0x8] sm:$0xff] }
 0x35e   :  { %v618_v47 = vpack.c.bf16 %v615_v46, %v614_v45  ;;  %v1275_v45 = vld [vmem:[#allocation7 + $0x10] sm:$0xf]  ;;  %v1343_v46 = vld [vmem:[#allocation7 + $0x14] sm:$0xf0] }
 0x35f   :  { %v1276_v50 = vor.u32 %v1343_v46, %v1275_v45 }
 0x360   :  { %1261 = vmatmul.msk.bf16.vlgmr.msra.gmra.mxu0 %vm142_vm0, %v618_v47  ;;  %1263 = vmatmul.msk.bf16.vlgmr.msra.gmra.mxu1 %vm142_vm0, %v618_v47  ;;  %v1342_v47 = vld [vmem:[#allocation7 + $0x14] sm:$0xf] }
 0x361   :  { %782 = vmatpush.bf16.msrb.mxu2 %v1276_v50  ;;  %962 = vmatpush.bf16.msrb.mxu0 %v1276_v50 }
 0x3cb   :  { %v447_v55 = vpop.f32.mrf.mxu0  ;;  %v460_v56 = vpop.f32.mrf.mxu1 }
 0x3cc   :  { %v464_v57 = vadd.f32 %v447_v55, %v164_v54  ;;  %v465_v2 = vadd.f32 %v460_v56, %v183_v0  ;;  %v1280_v54 = vor.u32 %v1342_v47, %v1277_v48  ;;  %v1267_v55 = vld [vmem:[#allocation7] sm:$0xf]  ;;  %v1341_v56 = vld [vmem:[#allocation7 + $0x4] sm:$0xf0] }
 0x3ce   :  { %v1221_v58 = vmul.f32 -1.442695, %v464_v57  ;;  %v1222_v15 = vmul.f32 -1.442695, %v465_v2  ;;  %v1340_v57 = vld [vmem:[#allocation7 + $0x4] sm:$0xf]  ;;  %795 = vmatpush.bf16.msrb.mxu3 %v1280_v54  ;;  %975 = vmatpush.bf16.msrb.mxu1 %v1280_v54 }
 0x3d0   :  { %1379 = vpow2.f32 %v1221_v58  ;;  %v1269_v58 = vld [vmem:[#allocation7 + $0x8] sm:$0xf0] }
 0x3d3   :  { %v449_v59 = vpop.f32.mrf.mxu0  ;;  %v462_v60 = vpop.f32.mrf.mxu1 }
 0x3d4   :  { %v1268_v59 = vor.u32 %v1341_v56, %v1267_v55  ;;  %v1272_v60 = vor.u32 %v1340_v57, %v1269_v58 }
 0x3d6   :  { %v1380_v61 = vpop.eup %1379  ;;  %783 = vmatpush.bf16.msrb.mxu2 %v1268_v59  ;;  %963 = vmatpush.bf16.msrb.mxu0 %v1268_v59 }
 0x3d7   :  { %v472_v63 = vadd.f32 1.0, %v1380_v61  ;;  %796 = vmatpush.bf16.msrb.mxu3 %v1272_v60  ;;  %976 = vmatpush.bf16.msrb.mxu1 %v1272_v60 }
 0x3d9   :  { %1381 = vrcp.f32 %v472_v63  ;;  %v485_v5 = vand.u32 2147483648, %v472_v63  ;;  %v483_v7 = vand.u32 2147483647, %v472_v63  ;;  %vm479_vm3 = vweird.f32 %v472_v63 }
 0x3da   :  { %1383 = vtanh.f32 %v465_v2 }
 0x3db   :  { %v486_v10 = vor.u32 1.1754944e-38, %v485_v5  ;;  %vm484_vm5 = vcmp.eq.f32.partialorder %v483_v7, 8.507059e+37  ;;  %1385 = vpow2.f32 %v1222_v15 }
 0x3df   :  { %v1382_v1 = vpop.eup %1381 }
 0x3e0   :  { %v475_v3 = vmul.f32 %v1382_v1, %v472_v63  ;;  %vm480_vm2 = vweird.f32 %v1382_v1  ;;  %v1384_v12 = vpop.eup %1383  ;;  %v166_v63 = vadd.f32 %v1707_v53, %v1659_v51 }
 0x3e1   :  { %vm481_vm4 = vmor %vm479_vm3, %vm480_vm2  ;;  %v1386_v16 = vpop.eup %1385 }
 0x3e2   :  { %v476_v4 = vsub.f32 1.0, %v475_v3  ;;  %v473_v17 = vadd.f32 1.0, %v1386_v16 }
 0x3e4   :  { %v477_v6 = vmul.f32 %v1382_v1, %v476_v4  ;;  %1387 = vrcp.f32 %v473_v17  ;;  %v500_v26 = vand.u32 2147483648, %v473_v17  ;;  %vm494_vm7 = vweird.f32 %v473_v17 }
 0x3e5   :  { %v498_v27 = vand.u32 2147483647, %v473_v17 }
 0x3e6   :  { %v478_v8 = vadd.f32 %v1382_v1, %v477_v6  ;;  %v501_v29 = vor.u32 1.1754944e-38, %v500_v26 }
 0x3e7   :  { %vm499_vm9 = vcmp.eq.f32.partialorder %v498_v27, 8.507059e+37 }
 0x3e8   :  { %v482_v11 = vsel %vm481_vm4, %v1382_v1, %v478_v8  ;;  %v689_v8 = vpop.f32.mrf.mxu0 }
 0x3e9   :  { %v487_v13 = vsel %vm484_vm5, %v486_v10, %v482_v11 }
 0x3ea   :  { %v506_v14 = vmul.f32 %v1384_v12, %v487_v13  ;;  %v1388_v18 = vpop.eup %1387  ;;  %v505_v22 = vmul.f32 %v487_v13, %v1686_v9  ;;  %v185_v13 = vadd.f32 %v1705_v52, %v1662_v62 }
 0x3eb   :  { %v490_v19 = vmul.f32 %v1388_v18, %v473_v17  ;;  %vm495_vm6 = vweird.f32 %v1388_v18 }
 0x3ec   :  { %508 = vrot.lane.b32.xlu2 %v506_v14, %s1533_s3  ;;  %vm496_vm8 = vmor %vm494_vm7, %vm495_vm6 }
 0x3ed   :  { %v491_v20 = vsub.f32 1.0, %v490_v19 }
 0x3ef   :  { %v492_v21 = vmul.f32 %v1388_v18, %v491_v20 }
 0x3f1   :  { %v493_v25 = vadd.f32 %v1388_v18, %v492_v21 }
 0x3f3   :  { %v497_v28 = vsel %vm496_vm8, %v1388_v18, %v493_v25 }
 0x3f4   :  { %v502_v31 = vsel %vm499_vm9, %v501_v29, %v497_v28 }
 0x446   :  { %v509_v23 = vpop.permute.xlu2 %508 }
 0x447   :  { %v1713_v24 = vadd.f32 %v509_v23, %v505_v22 }
 0x449   :  { %1389 = vtanh.f32 %v1713_v24 }
 0x44f   :  { %v1390_v30 = vpop.eup %1389 }
 0x450   :  { %v1716_v32 = vmul.f32 %v1390_v30, %v502_v31  ;;  %v708_v31 = vpop.f32.mrf.mxu1 }
 0x452   :  { %v525_v9 = vpack.c.bf16 %v1716_v32, %v1716_v32 }
 0x454   :  { %527 = vrot.lane.b32.xlu2 %v525_v9, %s1533_s3 }
 0x4ae   :  { %v528_v61 = vpop.permute.xlu2 %527 }
 0x4af   :  { %1224 = vmatmul.msk.bf16.vlgmr.msra.gmra.mxu2 %vm142_vm0, %v528_v61  ;;  %1225 = vmatmul.msk.bf16.vlgmr.msra.gmra.mxu3 %vm142_vm0, %v528_v61 }
 0x4b0   :  { %870 = vmatpush.bf16.msra.mxu2 %v1292_v36  ;;  %883 = vmatpush.bf16.msra.mxu3 %v1296_v40 }
 0x4b4   :  { %871 = vmatpush.bf16.msra.mxu2 %v1284_v43  ;;  %884 = vmatpush.bf16.msra.mxu3 %v1288_v44 }
 0x4b8   :  { %872 = vmatpush.bf16.msra.mxu2 %v1276_v50  ;;  %885 = vmatpush.bf16.msra.mxu3 %v1280_v54 }
 0x4bc   :  { %873 = vmatpush.bf16.msra.mxu2 %v1268_v59  ;;  %886 = vmatpush.bf16.msra.mxu3 %v1272_v60 }
 0x4bf   :  { %784 = vmatmul.bf16.vlgmr.msrb.gmra.mxu2 %v1532_v49  ;;  %797 = vmatmul.bf16.vlgmr.msrb.gmra.mxu3 %v1532_v49  ;;  %v628_v49 = vld [vmem:[%s1832_s6] sm:$0x3] }
 0x4c0   :  { %1050 = vmatpush.bf16.msrb.mxu2 %v1292_v36  ;;  %1063 = vmatpush.bf16.msrb.mxu3 %v1296_v40  ;;  %v1730_v7 = vperm.slane %v628_v49, 0  ;;  %v1735_v29 = vperm.slane %v628_v49, 1 }
 0x4c2   :  { %v690_v11 = vadd.f32 %v689_v8, %v1730_v7  ;;  %v709_v33 = vadd.f32 %v708_v31, %v1735_v29 }
 0x4c4   :  { %1051 = vmatpush.bf16.msrb.mxu2 %v1284_v43  ;;  %1064 = vmatpush.bf16.msrb.mxu3 %v1288_v44 }
 0x4c8   :  { %1052 = vmatpush.bf16.msrb.mxu2 %v1276_v50  ;;  %1065 = vmatpush.bf16.msrb.mxu3 %v1280_v54 }
 0x4cc   :  { %1053 = vmatpush.bf16.msrb.mxu2 %v1268_v59  ;;  %1066 = vmatpush.bf16.msrb.mxu3 %v1272_v60 }
 0x532   :  { %v541_v0 = vpop.f32.mrf.mxu2  ;;  %v554_v1 = vpop.f32.mrf.mxu3 }
 0x533   :  { %v558_v2 = vadd.f32 %v541_v0, %v166_v63  ;;  %v559_v16 = vadd.f32 %v554_v1, %v185_v13 }
 0x535   :  { %v1226_v3 = vmul.f32 -1.442695, %v558_v2  ;;  %v1227_v48 = vmul.f32 -1.442695, %v559_v16 }
 0x537   :  { %1391 = vpow2.f32 %v1226_v3 }
 0x53a   :  { %v543_v4 = vpop.f32.mrf.mxu2  ;;  %v556_v5 = vpop.f32.mrf.mxu3 }
 0x53d   :  { %v1392_v6 = vpop.eup %1391 }
 0x53e   :  { %v566_v10 = vadd.f32 1.0, %v1392_v6 }
 0x540   :  { %1393 = vrcp.f32 %v566_v10  ;;  %v579_v20 = vand.u32 2147483648, %v566_v10  ;;  %v577_v23 = vand.u32 2147483647, %v566_v10  ;;  %vm573_vm11 = vweird.f32 %v566_v10 }
 0x542   :  { %v785_v51 = vpop.f32.mrf.mxu2  ;;  %v798_v53 = vpop.f32.mrf.mxu3  ;;  %v580_v28 = vor.u32 1.1754944e-38, %v579_v20  ;;  %vm578_vm13 = vcmp.eq.f32.partialorder %v577_v23, 8.507059e+37 }
 0x543   :  { %v802_v12 = vadd.f32 %v785_v51, %v690_v11  ;;  %v803_v35 = vadd.f32 %v798_v53, %v709_v33 }
 0x545   :  { %v1297_v14 = vmul.f32 -1.442695, %v802_v12  ;;  %v1298_v47 = vmul.f32 -1.442695, %v803_v35 }
 0x546   :  { %v1394_v15 = vpop.eup %1393 }
 0x547   :  { %v569_v17 = vmul.f32 %v1394_v15, %v566_v10  ;;  %1395 = vpow2.f32 %v1297_v14  ;;  %vm574_vm10 = vweird.f32 %v1394_v15 }
 0x548   :  { %1397 = vtanh.f32 %v559_v16  ;;  %vm575_vm12 = vmor %vm573_vm11, %vm574_vm10 }
 0x549   :  { %v570_v18 = vsub.f32 1.0, %v569_v17 }
 0x54a   :  { %v787_v19 = vpop.f32.mrf.mxu2  ;;  %v800_v21 = vpop.f32.mrf.mxu3 }
 0x54b   :  { %v571_v22 = vmul.f32 %v1394_v15, %v570_v18 }
 0x54d   :  { %v1396_v25 = vpop.eup %1395  ;;  %v572_v26 = vadd.f32 %v1394_v15, %v571_v22 }
 0x54e   :  { %v810_v27 = vadd.f32 1.0, %v1396_v25  ;;  %v1398_v52 = vpop.eup %1397 }
 0x54f   :  { %v576_v62 = vsel %vm575_vm12, %v1394_v15, %v572_v26 }
 0x550   :  { %1399 = vrcp.f32 %v810_v27  ;;  %v581_v30 = vsel %vm578_vm13, %v580_v28, %v576_v62  ;;  %v823_v38 = vand.u32 2147483648, %v810_v27  ;;  %v821_v40 = vand.u32 2147483647, %v810_v27  ;;  %v691_v62 = vpop.f32.mrf.mxu0 }
 0x551   :  { %v600_v9 = vmul.f32 %v1398_v52, %v581_v30  ;;  %1401 = vtanh.f32 %v803_v35  ;;  %vm817_vm15 = vweird.f32 %v810_v27  ;;  %v599_v10 = vmul.f32 %v581_v30, %v1713_v24 }
 0x552   :  { %v824_v42 = vor.u32 1.1754944e-38, %v823_v38  ;;  %vm822_vm2 = vcmp.eq.f32.partialorder %v821_v40, 8.507059e+37  ;;  %1403 = vpow2.f32 %v1298_v47  ;;  %v692_v52 = vadd.f32 %v691_v62, %v1730_v7  ;;  %v710_v38 = vpop.f32.mrf.mxu1 }
 0x553   :  { %602 = vrot.lane.b32.xlu1 %v600_v9, %s1533_s3  ;;  %1405 = vpow2.f32 %v1227_v48 }
 0x556   :  { %v1400_v34 = vpop.eup %1399 }
 0x557   :  { %v813_v36 = vmul.f32 %v1400_v34, %v810_v27  ;;  %vm818_vm14 = vweird.f32 %v1400_v34  ;;  %v1402_v44 = vpop.eup %1401 }
 0x558   :  { %vm819_vm1 = vmor %vm817_vm15, %vm818_vm14  ;;  %v1404_v50 = vpop.eup %1403 }
 0x559   :  { %v814_v37 = vsub.f32 1.0, %v813_v36  ;;  %v811_v54 = vadd.f32 1.0, %v1404_v50  ;;  %v1406_v55 = vpop.eup %1405 }
 0x55a   :  { %v567_v56 = vadd.f32 1.0, %v1406_v55 }
 0x55b   :  { %v815_v39 = vmul.f32 %v1400_v34, %v814_v37  ;;  %1407 = vrcp.f32 %v811_v54  ;;  %v838_v4 = vand.u32 2147483648, %v811_v54  ;;  %vm832_vm4 = vweird.f32 %v811_v54 }
 0x55c   :  { %1409 = vrcp.f32 %v567_v56  ;;  %v836_v5 = vand.u32 2147483647, %v811_v54  ;;  %v594_v16 = vand.u32 2147483648, %v567_v56  ;;  %vm588_vm8 = vweird.f32 %v567_v56 }
 0x55d   :  { %v816_v41 = vadd.f32 %v1400_v34, %v815_v39  ;;  %v839_v11 = vor.u32 1.1754944e-38, %v838_v4  ;;  %v592_v18 = vand.u32 2147483647, %v567_v56  ;;  %v711_v39 = vadd.f32 %v710_v38, %v1735_v29 }
 0x55e   :  { %vm837_vm6 = vcmp.eq.f32.partialorder %v836_v5, 8.507059e+37  ;;  %v595_v19 = vor.u32 1.1754944e-38, %v594_v16 }
 0x55f   :  { %v820_v43 = vsel %vm819_vm1, %v1400_v34, %v816_v41  ;;  %vm593_vm10 = vcmp.eq.f32.partialorder %v592_v18, 8.507059e+37 }
 0x560   :  { %v825_v45 = vsel %vm822_vm2, %v824_v42, %v820_v43 }
 0x561   :  { %v844_v46 = vmul.f32 %v1402_v44, %v825_v45  ;;  %v1408_v57 = vpop.eup %1407  ;;  %v843_v0 = vmul.f32 0.0, %v825_v45 }
 0x562   :  { %v828_v58 = vmul.f32 %v1408_v57, %v811_v54  ;;  %v1410_v60 = vpop.eup %1409  ;;  %vm833_vm3 = vweird.f32 %v1408_v57 }
 0x563   :  { %846 = vrot.lane.b32.xlu2 %v844_v46, %s1533_s3  ;;  %v584_v63 = vmul.f32 %v1410_v60, %v567_v56  ;;  %vm834_vm5 = vmor %vm832_vm4, %vm833_vm3  ;;  %vm589_vm7 = vweird.f32 %v1410_v60 }
 0x564   :  { %v829_v59 = vsub.f32 1.0, %v828_v58  ;;  %vm590_vm9 = vmor %vm588_vm8, %vm589_vm7 }
 0x565   :  { %v585_v49 = vsub.f32 1.0, %v584_v63 }
 0x566   :  { %v830_v61 = vmul.f32 %v1408_v57, %v829_v59 }
 0x567   :  { %v586_v8 = vmul.f32 %v1410_v60, %v585_v49 }
 0x568   :  { %v831_v3 = vadd.f32 %v1408_v57, %v830_v61 }
 0x569   :  { %v587_v15 = vadd.f32 %v1410_v60, %v586_v8 }
 0x56a   :  { %v835_v6 = vsel %vm834_vm5, %v1408_v57, %v831_v3 }
 0x56b   :  { %v840_v13 = vsel %vm837_vm6, %v839_v11, %v835_v6  ;;  %v591_v24 = vsel %vm590_vm9, %v1410_v60, %v587_v15 }
 0x56c   :  { %v596_v21 = vsel %vm593_vm10, %v595_v19, %v591_v24 }
 0x5bd   :  { %v847_v1 = vpop.permute.xlu2 %846 }
 0x5be   :  { %v1740_v2 = vadd.f32 %v847_v1, %v843_v0 }
 0x5c0   :  { %1411 = vtanh.f32 %v1740_v2 }
 0x5c5   :  { %v603_v51 = vpop.permute.xlu1 %602 }
 0x5c6   :  { %v1412_v53 = vpop.eup %1411  ;;  %v605_v12 = vadd.f32 %v603_v51, %v599_v10 }
 0x5c7   :  { %v1744_v14 = vmul.f32 %v1412_v53, %v840_v13 }
 0x5c8   :  { %1413 = vtanh.f32 %v605_v12 }
 0x5c9   :  { %v859_v17 = vpack.c.bf16 %v1744_v14, %v1744_v14 }
 0x5cb   :  { %861 = vrot.lane.b32.xlu0 %v859_v17, %s1533_s3 }
 0x5ce   :  { %v1414_v20 = vpop.eup %1413 }
 0x5cf   :  { %v607_v22 = vmul.f32 %v1414_v20, %v596_v21 }
 0x5d1   :  { %609 = vrot.lane.b32.xlu1 %v607_v22, %s1533_s3 }
 0x5d3   :  { %515 = vrot.lane.b32.xlu0 %v1716_v32, %s1533_s3 }
 0x63d   :  { %v862_v23 = vpop.permute.xlu0 %861 }
 0x63e   :  { %1299 = vmatmul.msk.bf16.vlgmr.msra.gmra.mxu2 %vm142_vm0, %v862_v23  ;;  %1300 = vmatmul.msk.bf16.vlgmr.msra.gmra.mxu3 %vm142_vm0, %v862_v23 }
 0x643   :  { %v610_v25 = vpop.permute.xlu1 %609 }
 0x644   :  { %1228 = vst.msk [vmem:[%s1833_s7 + $0x18] sm:$0xff] %vm142_vm0, %v610_v25 }
 0x645   :  { %v516_v26 = vpop.permute.xlu0 %515 }
 0x646   :  { %1223 = vst.msk [vmem:[%s1833_s7 + $0x10] sm:$0xff] %vm142_vm0, %v516_v26 }
 0x64b   :  { %v617_v27 = vld [vmem:[%s1833_s7 + $0x18] sm:$0xff] }
 0x64d   :  { %v616_v32 = vld [vmem:[%s1833_s7 + $0x10] sm:$0xff] }
 0x64e   :  { %v619_v28 = vpack.c.bf16 %v617_v27, %v616_v32 }
 0x650   :  { %1262 = vmatmul.msk.bf16.gmra.mxu0 %vm142_vm0, %v619_v28  ;;  %1264 = vmatmul.msk.bf16.gmra.mxu1 %vm142_vm0, %v619_v28 }
 0x6c1   :  { %v875_v30 = vpop.f32.mrf.mxu2  ;;  %v888_v31 = vpop.f32.mrf.mxu3 }
 0x6c2   :  { %v892_v9 = vadd.f32 %v875_v30, %v692_v52  ;;  %v893_v41 = vadd.f32 %v888_v31, %v711_v39 }
 0x6c4   :  { %v1301_v33 = vmul.f32 -1.442695, %v892_v9  ;;  %v1302_v57 = vmul.f32 -1.442695, %v893_v41 }
 0x6c6   :  { %1415 = vpow2.f32 %v1301_v33 }
 0x6c9   :  { %v877_v34 = vpop.f32.mrf.mxu2  ;;  %v890_v35 = vpop.f32.mrf.mxu3 }
 0x6cc   :  { %v1416_v36 = vpop.eup %1415 }
 0x6cd   :  { %v900_v37 = vadd.f32 1.0, %v1416_v36  ;;  %v694_v13 = vpop.f32.mrf.mxu0  ;;  %v713_v15 = vpop.f32.mrf.mxu1 }
 0x6ce   :  { %v695_v18 = vadd.f32 %v694_v13, %v1730_v7  ;;  %v714_v32 = vadd.f32 %v713_v15, %v1735_v29 }
 0x6cf   :  { %1417 = vrcp.f32 %v900_v37  ;;  %v913_v44 = vand.u32 2147483648, %v900_v37  ;;  %v911_v46 = vand.u32 2147483647, %v900_v37  ;;  %vm907_vm12 = vweird.f32 %v900_v37 }
 0x6d0   :  { %1419 = vtanh.f32 %v893_v41 }
 0x6d1   :  { %v914_v48 = vor.u32 1.1754944e-38, %v913_v44  ;;  %vm912_vm14 = vcmp.eq.f32.partialorder %v911_v46, 8.507059e+37  ;;  %1421 = vpow2.f32 %v1302_v57 }
 0x6d5   :  { %v1418_v40 = vpop.eup %1417  ;;  %v1784_v16 = vpop.f32.mrf.mxu0 }
 0x6d6   :  { %v903_v42 = vmul.f32 %v1418_v40, %v900_v37  ;;  %vm908_vm11 = vweird.f32 %v1418_v40  ;;  %v1420_v54 = vpop.eup %1419  ;;  %v1786_v17 = vpop.f32.mrf.mxu1 }
 0x6d7   :  { %vm909_vm13 = vmor %vm907_vm12, %vm908_vm11  ;;  %v1422_v58 = vpop.eup %1421 }
 0x6d8   :  { %v904_v43 = vsub.f32 1.0, %v903_v42  ;;  %v901_v59 = vadd.f32 1.0, %v1422_v58 }
 0x6da   :  { %v905_v45 = vmul.f32 %v1418_v40, %v904_v43  ;;  %1423 = vrcp.f32 %v901_v59  ;;  %v928_v5 = vand.u32 2147483648, %v901_v59  ;;  %vm922_vm1 = vweird.f32 %v901_v59 }
 0x6db   :  { %v926_v6 = vand.u32 2147483647, %v901_v59 }
 0x6dc   :  { %v906_v47 = vadd.f32 %v1418_v40, %v905_v45  ;;  %v929_v10 = vor.u32 1.1754944e-38, %v928_v5 }
 0x6dd   :  { %vm927_vm3 = vcmp.eq.f32.partialorder %v926_v6, 8.507059e+37 }
 0x6de   :  { %v910_v50 = vsel %vm909_vm13, %v1418_v40, %v906_v47 }
 0x6df   :  { %v915_v55 = vsel %vm912_vm14, %v914_v48, %v910_v50 }
 0x6e0   :  { %v934_v56 = vmul.f32 %v1420_v54, %v915_v55  ;;  %v1424_v60 = vpop.eup %1423  ;;  %v933_v1 = vmul.f32 %v915_v55, %v1740_v2 }
 0x6e1   :  { %v918_v61 = vmul.f32 %v1424_v60, %v901_v59  ;;  %vm923_vm15 = vweird.f32 %v1424_v60 }
 0x6e2   :  { %936 = vrot.lane.b32.xlu2 %v934_v56, %s1533_s3  ;;  %vm924_vm2 = vmor %vm922_vm1, %vm923_vm15 }
 0x6e3   :  { %v919_v63 = vsub.f32 1.0, %v918_v61 }
 0x6e5   :  { %v920_v0 = vmul.f32 %v1424_v60, %v919_v63 }
 0x6e7   :  { %v921_v4 = vadd.f32 %v1424_v60, %v920_v0 }
 0x6e9   :  { %v925_v8 = vsel %vm924_vm2, %v1424_v60, %v921_v4 }
 0x6ea   :  { %v930_v51 = vsel %vm927_vm3, %v929_v10, %v925_v8 }
 0x73c   :  { %v937_v3 = vpop.permute.xlu2 %936 }
 0x73d   :  { %v1774_v49 = vadd.f32 %v937_v3, %v933_v1  ;;  %v697_v1 = vadd.f32 %v1784_v16, %v1730_v7 }
 0x73f   :  { %1425 = vtanh.f32 %v1774_v49 }
 0x745   :  { %v1426_v11 = vpop.eup %1425 }
 0x746   :  { %v1777_v53 = vmul.f32 %v1426_v11, %v930_v51  ;;  %v716_v51 = vadd.f32 %v1786_v17, %v1735_v29 }
 0x748   :  { %v949_v2 = vpack.c.bf16 %v1777_v53, %v1777_v53 }
 0x74a   :  { %951 = vrot.lane.b32.xlu2 %v949_v2, %s1533_s3 }
 0x7a4   :  { %v952_v12 = vpop.permute.xlu2 %951 }
 0x7a5   :  { %1304 = vmatmul.msk.bf16.vlgmr.msrb.gmra.mxu0 %vm142_vm0, %v952_v12  ;;  %1305 = vmatmul.msk.bf16.vlgmr.msrb.gmra.mxu1 %vm142_vm0, %v952_v12 }
 0x822   :  { %v965_v24 = vpop.f32.mrf.mxu0  ;;  %v978_v19 = vpop.f32.mrf.mxu1 }
 0x823   :  { %v982_v20 = vadd.f32 %v965_v24, %v695_v18  ;;  %v983_v28 = vadd.f32 %v978_v19, %v714_v32 }
 0x825   :  { %v1306_v21 = vmul.f32 -1.442695, %v982_v20  ;;  %v1307_v39 = vmul.f32 -1.442695, %v983_v28 }
 0x827   :  { %1427 = vpow2.f32 %v1306_v21 }
 0x82a   :  { %v967_v22 = vpop.f32.mrf.mxu0  ;;  %v980_v23 = vpop.f32.mrf.mxu1 }
 0x82d   :  { %v1428_v25 = vpop.eup %1427 }
 0x82e   :  { %v990_v26 = vadd.f32 1.0, %v1428_v25 }
 0x830   :  { %1429 = vrcp.f32 %v990_v26  ;;  %v1003_v30 = vand.u32 2147483648, %v990_v26  ;;  %v1001_v9 = vand.u32 2147483647, %v990_v26  ;;  %vm997_vm5 = vweird.f32 %v990_v26 }
 0x831   :  { %1431 = vtanh.f32 %v983_v28 }
 0x832   :  { %v1004_v34 = vor.u32 1.1754944e-38, %v1003_v30  ;;  %vm1002_vm7 = vcmp.eq.f32.partialorder %v1001_v9, 8.507059e+37  ;;  %1433 = vpow2.f32 %v1307_v39 }
 0x836   :  { %v1430_v27 = vpop.eup %1429 }
 0x837   :  { %v993_v62 = vmul.f32 %v1430_v27, %v990_v26  ;;  %vm998_vm4 = vweird.f32 %v1430_v27  ;;  %v1432_v36 = vpop.eup %1431 }
 0x838   :  { %vm999_vm6 = vmor %vm997_vm5, %vm998_vm4  ;;  %v1434_v40 = vpop.eup %1433 }
 0x839   :  { %v994_v52 = vsub.f32 1.0, %v993_v62  ;;  %v991_v41 = vadd.f32 1.0, %v1434_v40 }
 0x83b   :  { %v995_v31 = vmul.f32 %v1430_v27, %v994_v52  ;;  %1435 = vrcp.f32 %v991_v41  ;;  %v1018_v54 = vand.u32 2147483648, %v991_v41  ;;  %vm1012_vm9 = vweird.f32 %v991_v41 }
 0x83d   :  { %v996_v33 = vadd.f32 %v1430_v27, %v995_v31  ;;  %v1019_v56 = vor.u32 1.1754944e-38, %v1018_v54 }
 0x83f   :  { %v1000_v35 = vsel %vm999_vm6, %v1430_v27, %v996_v33 }
 0x840   :  { %v1005_v37 = vsel %vm1002_vm7, %v1004_v34, %v1000_v35 }
 0x841   :  { %v1024_v38 = vmul.f32 %v1432_v36, %v1005_v37  ;;  %v1436_v42 = vpop.eup %1435  ;;  %v1023_v46 = vmul.f32 %v1005_v37, %v1774_v49 }
 0x842   :  { %v1008_v43 = vmul.f32 %v1436_v42, %v991_v41  ;;  %vm1013_vm8 = vweird.f32 %v1436_v42 }
 0x843   :  { %1026 = vrot.lane.b32.xlu0 %v1024_v38, %s1533_s3  ;;  %vm1014_vm10 = vmor %vm1012_vm9, %vm1013_vm8 }
 0x844   :  { %v1009_v44 = vsub.f32 1.0, %v1008_v43 }
 0x846   :  { %v1010_v45 = vmul.f32 %v1436_v42, %v1009_v44 }
 0x848   :  { %v1011_v50 = vadd.f32 %v1436_v42, %v1010_v45 }
 0x84a   :  { %v1015_v55 = vsel %vm1014_vm10, %v1436_v42, %v1011_v50 }
 0x84b   :  { %853 = vrot.lane.b32.xlu0 %v1744_v14, %s1533_s3  ;;  %v1016_v14 = vand.u32 2147483647, %v991_v41 }
 0x84d   :  { %vm1017_vm11 = vcmp.eq.f32.partialorder %v1016_v14, 8.507059e+37 }
 0x84e   :  { %v1020_v59 = vsel %vm1017_vm11, %v1019_v56, %v1015_v55 }
 0x8b5   :  { %v1027_v47 = vpop.permute.xlu0 %1026 }
 0x8b6   :  { %v1794_v48 = vadd.f32 %v1027_v47, %v1023_v46 }
 0x8b8   :  { %1437 = vtanh.f32 %v1794_v48 }
 0x8bd   :  { %v854_v57 = vpop.permute.xlu0 %853 }
 0x8be   :  { %v1438_v58 = vpop.eup %1437  ;;  %856 = vst.msk [vmem:[%s1833_s7] sm:$0xff] %vm142_vm0, %v854_v57 }
 0x8bf   :  { %v1031_v60 = vmul.f32 %v1438_v58, %v1020_v59 }
 0x8c1   :  { %v1039_v61 = vpack.c.bf16 %v1031_v60, %v1031_v60 }
 0x8c3   :  { %1041 = vrot.lane.b32.xlu1 %v1039_v61, %s1533_s3 }
 0x8cb   :  { %943 = vrot.lane.b32.xlu1 %v1777_v53, %s1533_s3 }
 0x935   :  { %v1042_v63 = vpop.permute.xlu1 %1041 }
 0x936   :  { %1309 = vmatmul.msk.bf16.vlgmr.msrb.gmra.mxu2 %vm142_vm0, %v1042_v63  ;;  %1310 = vmatmul.msk.bf16.vlgmr.msrb.gmra.mxu3 %vm142_vm0, %v1042_v63 }
 0x93d   :  { %v944_v0 = vpop.permute.xlu1 %943 }
 0x93e   :  { %1303 = vst.msk [vmem:[%s1833_s7 + $0x8] sm:$0xff] %vm142_vm0, %v944_v0 }
 0x9b9   :  { %v1055_v3 = vpop.f32.mrf.mxu2  ;;  %v1068_v49 = vpop.f32.mrf.mxu3 }
 0x9ba   :  { %v1072_v4 = vadd.f32 %v1055_v3, %v697_v1  ;;  %v1073_v2 = vadd.f32 %v1068_v49, %v716_v51 }
 0x9bc   :  { %v1311_v5 = vmul.f32 -1.442695, %v1072_v4  ;;  %v1312_v29 = vmul.f32 -1.442695, %v1073_v2 }
 0x9be   :  { %1439 = vpow2.f32 %v1311_v5 }
 0x9c1   :  { %v1057_v6 = vpop.f32.mrf.mxu2  ;;  %v1070_v8 = vpop.f32.mrf.mxu3 }
 0x9c4   :  { %v1440_v10 = vpop.eup %1439 }
 0x9c5   :  { %v1080_v11 = vadd.f32 1.0, %v1440_v10 }
 0x9c7   :  { %1441 = vrcp.f32 %v1080_v11  ;;  %v1093_v15 = vand.u32 2147483648, %v1080_v11  ;;  %v1091_v16 = vand.u32 2147483647, %v1080_v11  ;;  %vm1087_vm13 = vweird.f32 %v1080_v11 }
 0x9c8   :  { %1443 = vtanh.f32 %v1073_v2 }
 0x9c9   :  { %v1094_v24 = vor.u32 1.1754944e-38, %v1093_v15  ;;  %vm1092_vm15 = vcmp.eq.f32.partialorder %v1091_v16, 8.507059e+37  ;;  %1445 = vpow2.f32 %v1312_v29 }
 0x9cd   :  { %v1442_v53 = vpop.eup %1441 }
 0x9ce   :  { %v1083_v12 = vmul.f32 %v1442_v53, %v1080_v11  ;;  %vm1088_vm12 = vweird.f32 %v1442_v53  ;;  %v1444_v20 = vpop.eup %1443 }
 0x9cf   :  { %vm1089_vm14 = vmor %vm1087_vm13, %vm1088_vm12  ;;  %v1446_v17 = vpop.eup %1445 }
 0x9d0   :  { %v1084_v13 = vsub.f32 1.0, %v1083_v12  ;;  %v1081_v23 = vadd.f32 1.0, %v1446_v17 }
 0x9d2   :  { %v1085_v7 = vmul.f32 %v1442_v53, %v1084_v13  ;;  %1447 = vrcp.f32 %v1081_v23  ;;  %v1108_v31 = vand.u32 2147483648, %v1081_v23  ;;  %vm1102_vm2 = vweird.f32 %v1081_v23 }
 0x9d3   :  { %v1106_v9 = vand.u32 2147483647, %v1081_v23 }
 0x9d4   :  { %v1086_v18 = vadd.f32 %v1442_v53, %v1085_v7  ;;  %v1109_v34 = vor.u32 1.1754944e-38, %v1108_v31 }
 0x9d5   :  { %vm1107_vm4 = vcmp.eq.f32.partialorder %v1106_v9, 8.507059e+37 }
 0x9d6   :  { %v1090_v19 = vsel %vm1089_vm14, %v1442_v53, %v1086_v18 }
 0x9d7   :  { %v1095_v21 = vsel %vm1092_vm15, %v1094_v24, %v1090_v19 }
 0x9d8   :  { %v1114_v22 = vmul.f32 %v1444_v20, %v1095_v21  ;;  %v1448_v25 = vpop.eup %1447  ;;  %v1113_v28 = vmul.f32 %v1095_v21, %v1794_v48 }
 0x9d9   :  { %v1098_v26 = vmul.f32 %v1448_v25, %v1081_v23  ;;  %vm1103_vm1 = vweird.f32 %v1448_v25 }
 0x9da   :  { %1116 = vrot.lane.b32.xlu2 %v1114_v22, %s1533_s3  ;;  %vm1104_vm3 = vmor %vm1102_vm2, %vm1103_vm1 }
 0x9db   :  { %v1099_v32 = vsub.f32 1.0, %v1098_v26 }
 0x9dd   :  { %v1100_v27 = vmul.f32 %v1448_v25, %v1099_v32 }
 0x9df   :  { %v1101_v30 = vadd.f32 %v1448_v25, %v1100_v27 }
 0x9e1   :  { %v1105_v33 = vsel %vm1104_vm3, %v1448_v25, %v1101_v30 }
 0x9e2   :  { %1033 = vrot.lane.b32.xlu2 %v1031_v60, %s1533_s3  ;;  %v1110_v37 = vsel %vm1107_vm4, %v1109_v34, %v1105_v33 }
 0xa34   :  { %v1117_v62 = vpop.permute.xlu2 %1116 }
 0xa35   :  { %v1119_v52 = vadd.f32 %v1117_v62, %v1113_v28 }
 0xa37   :  { %1449 = vtanh.f32 %v1119_v52 }
 0xa3c   :  { %v1034_v35 = vpop.permute.xlu2 %1033 }
 0xa3d   :  { %v1450_v36 = vpop.eup %1449  ;;  %1308 = vst.msk [vmem:[%s1833_s7 + $0x10] sm:$0xff] %vm142_vm0, %v1034_v35 }
 0xa3e   :  { %v1121_v38 = vmul.f32 %v1450_v36, %v1110_v37 }
 0xa40   :  { %1123 = vrot.lane.b32.xlu0 %v1121_v38, %s1533_s3 }
 0xab2   :  { %v1124_v39 = vpop.permute.xlu0 %1123 }
 0xab3   :  { %1313 = vst.msk [vmem:[%s1833_s7 + $0x18] sm:$0xff] %vm142_vm0, %v1124_v39 }
 0xab4   :  { %1131 = vsyncpa [#allocation4], 1 }
 0xab5   :  { %1132 = vsyncpa [#allocation6], 1 }

</bundles_post_ra>
